<compile_context>
chip_gen: v6e
topology: v6e:2x2x1
jax: 0.10.0
libtpu: 0.0.40
codegen_flags: <defaults>
</compile_context>

<pallas_src>
import functools
import math

import jax
import jax.numpy as jnp
from jax import lax
from jax.experimental import pallas as pl
from jax.experimental.pallas import tpu as pltpu


# --------------------------------------------------------------------------- #
# Pallas kernel: distance-aware attention core, one (batch, q-tile) per grid cell
# --------------------------------------------------------------------------- #
def _deakt_attention_kernel(zero_pad, n_heads, d_k,
                            gamma_ref,                 # SMEM (h,) f32: -softplus(gammas)
                            q_ref,                     # VMEM (tq, d_model) bf16 (pre-scaled)
                            k_ref, v_ref,              # VMEM (seq, d_model) bf16
                            mask_ref, dam_ref,         # VMEM (tq, seq) int8
                            pos_ref,                   # VMEM (tq, seq) f32: |i - j|
                            tri_ref,                   # VMEM (seq, seq) bf16: [t > j]
                            o_ref):                    # VMEM (tq, d_model) f32
    neg_big = jnp.float32(-1e32)

    mask_ok = mask_ref[...] != 0
    dam_ok = dam_ref[...] != 0
    keep = jnp.logical_and(mask_ok, dam_ok)            # fused mask for the post-decay fill
    pos = pos_ref[...]
    tri = tri_ref[...]

    # Static unroll over heads: all heads reuse the resident q/k/v/mask/dam tiles and each
    # head writes its own d_k-wide column slice of the lane-dense output slab.
    for hh in range(n_heads):
        sl = slice(hh * d_k, (hh + 1) * d_k)
        qh = q_ref[:, sl]                               # (tq, d_k) bf16, already * 1/sqrt(d_k)
        kh = k_ref[:, sl]                               # (seq, d_k) bf16
        vh = v_ref[:, sl]                               # (seq, d_k) bf16

        # scores = (q / sqrt(d_k)) @ k^T   -- bf16 in / f32 accumulate on the MXU.
        scores = lax.dot_general(qh, kh, (((1,), (1,)), ((), ())),
                                 preferred_element_type=jnp.float32)    # (tq, seq)

        # ---- detached "distance" branch (the torch.no_grad block). Faithful to the
        # reference: its `mask` fill of scores_ is overwritten, so only `dam` masks here.
        s_ = jnp.where(dam_ok, scores, neg_big)
        m_ = jnp.max(s_, axis=-1, keepdims=True)
        e_ = jnp.exp(s_ - m_)
        p_ = e_ * (1.0 / jnp.sum(e_, axis=-1, keepdims=True))   # exact: precision-sensitive branch
        p_ = jnp.where(keep, p_, 0.0)                           # * mask * dam
        # (disttotal - distcum)[i, j] = sum_{t > j} p_[i, t]  -> suffix sum as ONE bf16 MXU
        # matmul with a precomputed strictly-lower-triangular ones matrix.
        # TODO(synk): for very long seq replace with a log-step pltpu.roll suffix scan (XLU).
        suffix = jnp.dot(p_.astype(jnp.bfloat16), tri,
                         preferred_element_type=jnp.float32)
        dist = jnp.sqrt(jnp.maximum(suffix * pos, 0.0))

        gamma = gamma_ref[hh]                                    # -softplus(gammas[head])
        total_effect = jnp.clip(jnp.exp(dist * gamma), 1e-5, 1e5)

        # ---- final masked softmax (mask & dam fused into a single select) ----
        sc = jnp.where(keep, scores * total_effect, neg_big)
        m2 = jnp.max(sc, axis=-1, keepdims=True)
        e2 = jnp.exp(sc - m2)
        p = e2 * pl.reciprocal(jnp.sum(e2, axis=-1, keepdims=True), approx=True)

        # P @ V (bf16 in / f32 acc); write head hh's columns of the (tq, d_model) slab.
        o_ref[:, sl] = jnp.dot(p.astype(jnp.bfloat16), vh,
                               preferred_element_type=jnp.float32).astype(o_ref.dtype)

    if zero_pad:
        # zero_pad == zero the first GLOBAL query row; applied after P@V so it is a single
        # d_model-wide store, paid only by the q-tile that contains row 0.
        @pl.when(pl.program_id(1) == 0)
        def _():
            o_ref[0:1, :] = jnp.zeros((1, o_ref.shape[1]), o_ref.dtype)

    # TODO(synk): training-mode attention-weight dropout not implemented (eval / p=0 path).


def deakt_attention(q, k, v, mask, dam, gammas, *, n_heads, zero_pad):
    """Fused distance-aware attention (deakt.attention), head-packed lane-dense layout.

    q, k, v : (bs, seq, d_model) f32 projected activations (head h in columns [h*d_k,(h+1)*d_k))
    mask    : (seq, seq) 0/1, shared across batch & head
    dam     : (bs, seq, seq) or (seq, seq) 0/1
    gammas  : (h,) or (h, 1, 1) raw parameter (softplus applied here)
    returns : (bs, seq, d_model) f32, heads concatenated along the feature axis.
    """
    bs, seq, d_model = q.shape
    d_k = d_model // n_heads
    scale = 1.0 / math.sqrt(d_k)

    # Query-tile size: sublane/lane friendly tiles for long sequences, full seq otherwise.
    tq = seq
    for cand in (512, 256, 128):
        if seq % cand == 0:
            tq = cand
            break
    n_qt = seq // tq

    # bf16 on the wire and into the MXU; 1/sqrt(d_k) folded into q ahead of the dot.
    q_bf = (q * jnp.float32(scale)).astype(jnp.bfloat16)
    k_bf = k.astype(jnp.bfloat16)
    v_bf = v.astype(jnp.bfloat16)

    # mask/dam shipped as int8 (4x less DMA than f32); compared against 0 in-kernel.
    mask_i8 = (jnp.asarray(mask).reshape(seq, seq) != 0).astype(jnp.int8)
    dam_arr = jnp.asarray(dam)
    if dam_arr.ndim == 2:
        dam_arr = dam_arr[None]
    dam_i8 = (dam_arr != 0).astype(jnp.int8)
    dam_batched = dam_i8.shape[0] != 1        # (1, seq, seq) dam is NOT broadcast in HBM

    # Host-precomputed (seq, seq) constants: |i - j| and the strictly-lower-triangular ones
    # matrix for the suffix-sum matmul (constant index_map -> fetched once, kept resident).
    idx = jnp.arange(seq, dtype=jnp.float32)
    pos = jnp.abs(idx[None, :] - idx[:, None])
    tri = (idx[:, None] > idx[None, :]).astype(jnp.bfloat16)

    gamma_neg = -jax.nn.softplus(jnp.asarray(gammas, jnp.float32).reshape(n_heads))

    kernel = functools.partial(_deakt_attention_kernel, bool(zero_pad), n_heads, d_k)

    dam_map = (lambda b, t: (b, t, 0)) if dam_batched else (lambda b, t: (0, t, 0))

    # Grid = (batch, q-tile). k/v (and tri) have index maps independent of the inner q-tile
    # axis, so they are not re-DMA'd across consecutive tiles; the output block is written
    # fully per cell, so both axes are safe to mark "parallel" (v7x megacore sharding).
    return pl.pallas_call(
        kernel,
        out_shape=jax.ShapeDtypeStruct((bs, seq, d_model), jnp.float32),
        grid=(bs, n_qt),
        in_specs=[
            pl.BlockSpec(memory_space=pltpu.MemorySpace.SMEM),             # gamma (h,)
            pl.BlockSpec((None, tq, d_model), lambda b, t: (b, t, 0)),     # q  (bf16)
            pl.BlockSpec((None, seq, d_model), lambda b, t: (b, 0, 0)),    # k  (bf16)
            pl.BlockSpec((None, seq, d_model), lambda b, t: (b, 0, 0)),    # v  (bf16)
            pl.BlockSpec((tq, seq), lambda b, t: (t, 0)),                  # mask (i8)
            pl.BlockSpec((None, tq, seq), dam_map),                        # dam  (i8)
            pl.BlockSpec((tq, seq), lambda b, t: (t, 0)),                  # |i-j| (f32)
            pl.BlockSpec((seq, seq), lambda b, t: (0, 0)),                 # tri (bf16)
        ],
        out_specs=pl.BlockSpec((None, tq, d_model), lambda b, t: (b, t, 0)),
        compiler_params=pltpu.CompilerParams(
            dimension_semantics=("parallel", "parallel"),
            vmem_limit_bytes=32 * 1024 * 1024),
    )(gamma_neg, q_bf, k_bf, v_bf, mask_i8, dam_i8, pos, tri)


# --------------------------------------------------------------------------- #
# Full module forward (projections left to XLA; the Pallas win is the attention core).
# --------------------------------------------------------------------------- #
def _linear(x, w, b):
    # torch nn.Linear: y = x @ W^T + b (default MXU precision per the perf review).
    return jnp.dot(x, w.T) + b


def multi_head_attention_forward(params, q, k, v, mask, dam, zero_pad,
                                 *, n_heads, kq_same=False):
    """deakt.MultiHeadAttention.forward (emb_type='qid', eval mode, pdiff=None)."""
    k_p = _linear(k, params["k_w"], params["k_b"])
    q_p = _linear(q, params["k_w"] if kq_same else params["q_w"],
                  params["k_b"] if kq_same else params["q_b"])
    v_p = _linear(v, params["v_w"], params["v_b"])
    # Head-packed lane-dense layout: the kernel writes the "concat" (bs, seq, d_model)
    # slab directly -> no transposes around the kernel.
    concat = deakt_attention(q_p, k_p, v_p, mask, dam, params["gammas"],
                             n_heads=n_heads, zero_pad=zero_pad)
    return _linear(concat, params["out_w"], params["out_b"])


# --------------------------------------------------------------------------- #
# Pure-JAX references mirroring the torch code (for the correctness check).
# mxu_round=True applies the same bf16 MXU-operand rounding the kernel uses.
# --------------------------------------------------------------------------- #
def _split_heads(x, n_heads, d_k):
    bs, seq, _ = x.shape
    return x.reshape(bs, seq, n_heads, d_k).transpose(0, 2, 1, 3)


def _ref_attention(q, k, v, d_k, mask2d, dam3d, zero_pad, gammas, *, mxu_round):
    bs, h, seq, _ = q.shape
    f32 = jnp.float32
    if mxu_round:
        rnd = lambda x: x.astype(jnp.bfloat16).astype(f32)
        prec = None
    else:
        rnd = lambda x: x
        prec = lax.Precision.HIGHEST
    scale = 1.0 / math.sqrt(d_k)
    scores = jnp.einsum("bhid,bhjd->bhij", rnd(q * scale), rnd(k),
                        precision=prec, preferred_element_type=f32)
    mask = mask2d[None, None]
    dam = dam3d[:, None]
    keep = jnp.logical_and(mask != 0, dam != 0)
    s_ = jnp.where(dam != 0, scores, -1e32)      # mask fill is overwritten in the torch code
    p_ = jax.nn.softmax(s_, axis=-1)
    p_ = jnp.where(keep, p_, 0.0)
    p_ = rnd(p_)
    distcum = jnp.cumsum(p_, axis=-1)
    disttotal = jnp.sum(p_, axis=-1, keepdims=True)
    x1 = jnp.arange(seq, dtype=f32)
    pos = jnp.abs(x1[None, :] - x1[:, None])[None, None]
    dist = jnp.sqrt(jnp.maximum((disttotal - distcum) * pos, 0.0))
    gamma = -jax.nn.softplus(jnp.asarray(gammas, f32).reshape(1, h, 1, 1))
    te = jnp.clip(jnp.exp(dist * gamma), 1e-5, 1e5)
    sc = jnp.where(keep, scores * te, -1e32)
    p = jax.nn.softmax(sc, axis=-1)
    if zero_pad:
        p = p.at[:, :, 0, :].set(0.0)
    return jnp.einsum("bhij,bhjd->bhid", rnd(p), rnd(v),
                      precision=prec, preferred_element_type=f32)


def _ref_forward(params, q, k, v, mask, dam, zero_pad, *, n_heads, kq_same, mxu_round):
    bs, seq, d_model = q.shape
    d_k = d_model // n_heads
    k_p = _linear(k, params["k_w"], params["k_b"])
    q_p = _linear(q, params["k_w"] if kq_same else params["q_w"],
                  params["k_b"] if kq_same else params["q_b"])
    v_p = _linear(v, params["v_w"], params["v_b"])
    attn = _ref_attention(_split_heads(q_p, n_heads, d_k),
                          _split_heads(k_p, n_heads, d_k),
                          _split_heads(v_p, n_heads, d_k),
                          d_k,
                          jnp.asarray(mask, jnp.float32).reshape(seq, seq),
                          jnp.asarray(dam, jnp.float32).reshape(-1, seq, seq),
                          zero_pad, params["gammas"], mxu_round=mxu_round)
    concat = attn.transpose(0, 2, 1, 3).reshape(bs, seq, d_model)
    return _linear(concat, params["out_w"], params["out_b"])


if __name__ == "__main__":
    root = jax.random.PRNGKey(0)
    ks = jax.random.split(root, 9)

    bs, seq, d_model, n_heads = 2, 8, 32, 4
    zero_pad = True
    kq_same = False

    def xavier(kk, shape):
        bound = math.sqrt(6.0 / (shape[0] + shape[1]))
        return jax.random.uniform(kk, shape, jnp.float32, -bound, bound)

    params = {
        "q_w": xavier(ks[0], (d_model, d_model)), "q_b": jnp.zeros((d_model,), jnp.float32),
        "k_w": xavier(ks[1], (d_model, d_model)), "k_b": jnp.zeros((d_model,), jnp.float32),
        "v_w": xavier(ks[2], (d_model, d_model)), "v_b": jnp.zeros((d_model,), jnp.float32),
        "out_w": xavier(ks[3], (d_model, d_model)), "out_b": jnp.zeros((d_model,), jnp.float32),
        "gammas": 0.3 * jax.random.normal(ks[4], (n_heads, 1, 1), jnp.float32),
    }

    q = jax.random.normal(ks[5], (bs, seq, d_model), jnp.float32)
    k = jax.random.normal(ks[6], (bs, seq, d_model), jnp.float32)
    v = jax.random.normal(ks[7], (bs, seq, d_model), jnp.float32)

    mask = jnp.tril(jnp.ones((seq, seq), jnp.float32))                      # causal mask
    dam = (jax.random.uniform(ks[8], (bs, seq, seq)) > 0.15).astype(jnp.float32)

    out = multi_head_attention_forward(params, q, k, v, mask, dam, zero_pad,
                                       n_heads=n_heads, kq_same=kq_same)
    out = jax.block_until_ready(out)
    assert out.shape == (bs, seq, d_model), out.shape

    # Check 1: reference with the SAME bf16-in/f32-acc MXU precision policy (tight).
    ref_bf = _ref_forward(params, q, k, v, mask, dam, zero_pad,
                          n_heads=n_heads, kq_same=kq_same, mxu_round=True)
    err_bf = float(jnp.max(jnp.abs(out - ref_bf)))
    assert jnp.allclose(out, ref_bf, atol=2e-2, rtol=2e-2), f"max abs err {err_bf}"

    # Check 2: full-f32 torch-faithful reference (loose; the only delta is the deliberate
    # bf16 rounding of the MXU operands in the kernel).
    ref_f32 = _ref_forward(params, q, k, v, mask, dam, zero_pad,
                           n_heads=n_heads, kq_same=kq_same, mxu_round=False)
    err_f32 = float(jnp.max(jnp.abs(out - ref_f32)))
    assert jnp.allclose(out, ref_f32, atol=1e-1), f"max abs err vs f32 ref {err_f32}"

    print("KERNEL_OK")
</pallas_src>

<mosaic_0001>
module attributes {stable_mosaic.version = 11 : i64} {
  func.func @_deakt_attention_kernel(%arg0: i32, %arg1: i32, %arg2: memref<4xf32, #tpu.memory_space<smem>>, %arg3: memref<1x8x32xbf16, #tpu.memory_space<vmem>>, %arg4: memref<1x8x32xbf16, #tpu.memory_space<vmem>>, %arg5: memref<1x8x32xbf16, #tpu.memory_space<vmem>>, %arg6: memref<8x8xi8, #tpu.memory_space<vmem>>, %arg7: memref<1x8x8xi8, #tpu.memory_space<vmem>>, %arg8: memref<8x8xf32, #tpu.memory_space<vmem>>, %arg9: memref<8x8xbf16, #tpu.memory_space<vmem>>, %arg10: memref<1x8x32xf32, #tpu.memory_space<vmem>>) attributes {dimension_semantics = [#tpu.dimension_semantics<parallel>, #tpu.dimension_semantics<parallel>], iteration_bounds = array<i64: 2, 1>, scalar_prefetch = 0 : i64, scratch_operands = 0 : i64, tpu.core_type = #tpu.core_type<tc>, window_params = [{transform_indices = @transform_0, window_bounds = array<i64: 4>}, {transform_indices = @transform_1, window_bounds = array<i64: 1, 8, 32>}, {transform_indices = @transform_2, window_bounds = array<i64: 1, 8, 32>}, {transform_indices = @transform_3, window_bounds = array<i64: 1, 8, 32>}, {transform_indices = @transform_4, window_bounds = array<i64: 8, 8>}, {transform_indices = @transform_5, window_bounds = array<i64: 1, 8, 8>}, {transform_indices = @transform_6, window_bounds = array<i64: 8, 8>}, {pipeline_mode = #tpu.pipeline_mode<synchronous>, transform_indices = @transform_7, window_bounds = array<i64: 8, 8>}, {transform_indices = @transform_8, window_bounds = array<i64: 1, 8, 32>}]} {
    %c0 = arith.constant 0 : index
    %c0_0 = arith.constant 0 : index
    %0 = vector.load %arg6[%c0, %c0_0] : memref<8x8xi8, #tpu.memory_space<vmem>>, vector<8x8xi8>
    %c0_i8 = arith.constant 0 : i8
    %1 = vector.broadcast %c0_i8 : i8 to vector<8x8xi8>
    %2 = arith.cmpi ne, %0, %1 : vector<8x8xi8>
    %c0_1 = arith.constant 0 : index
    %c0_2 = arith.constant 0 : index
    %c0_3 = arith.constant 0 : index
    %3 = vector.load %arg7[%c0_1, %c0_2, %c0_3] : memref<1x8x8xi8, #tpu.memory_space<vmem>>, vector<1x8x8xi8>
    %4 = vector.shape_cast %3 : vector<1x8x8xi8> to vector<8x8xi8>
    %c0_i8_4 = arith.constant 0 : i8
    %5 = vector.broadcast %c0_i8_4 : i8 to vector<8x8xi8>
    %6 = arith.cmpi ne, %4, %5 : vector<8x8xi8>
    %7 = arith.andi %2, %6 : vector<8x8xi1>
    %c0_5 = arith.constant 0 : index
    %c0_6 = arith.constant 0 : index
    %8 = vector.load %arg8[%c0_5, %c0_6] : memref<8x8xf32, #tpu.memory_space<vmem>>, vector<8x8xf32>
    %c0_7 = arith.constant 0 : index
    %c0_8 = arith.constant 0 : index
    %9 = vector.load %arg9[%c0_7, %c0_8] : memref<8x8xbf16, #tpu.memory_space<vmem>>, vector<8x8xbf16>
    %c0_9 = arith.constant 0 : index
    %c0_10 = arith.constant 0 : index
    %c0_11 = arith.constant 0 : index
    %10 = vector.load %arg3[%c0_9, %c0_10, %c0_11] : memref<1x8x32xbf16, #tpu.memory_space<vmem>>, vector<1x8x8xbf16>
    %11 = vector.shape_cast %10 : vector<1x8x8xbf16> to vector<8x8xbf16>
    %c0_12 = arith.constant 0 : index
    %c0_13 = arith.constant 0 : index
    %c0_14 = arith.constant 0 : index
    %12 = vector.load %arg4[%c0_12, %c0_13, %c0_14] : memref<1x8x32xbf16, #tpu.memory_space<vmem>>, vector<1x8x8xbf16>
    %13 = vector.shape_cast %12 : vector<1x8x8xbf16> to vector<8x8xbf16>
    %c0_15 = arith.constant 0 : index
    %c0_16 = arith.constant 0 : index
    %c0_17 = arith.constant 0 : index
    %14 = vector.load %arg5[%c0_15, %c0_16, %c0_17] : memref<1x8x32xbf16, #tpu.memory_space<vmem>>, vector<1x8x8xbf16>
    %15 = vector.shape_cast %14 : vector<1x8x8xbf16> to vector<8x8xbf16>
    %cst = arith.constant dense<0.000000e+00> : vector<8x8xf32>
    %16 = tpu.matmul %11, %13, %cst {dimension_numbers = #tpu.dot_dimension_numbers<[1], [1], [0], [0], [0, 0, 1, 0], [], []>} : vector<8x8xbf16>, vector<8x8xbf16>, vector<8x8xf32> -> vector<8x8xf32>
    %cst_18 = arith.constant -1.000000e+32 : f32
    %17 = vector.broadcast %cst_18 : f32 to vector<8x8xf32>
    %18 = arith.select %6, %16, %17 : vector<8x8xi1>, vector<8x8xf32>
    %cst_19 = arith.constant dense<0xFF800000> : vector<8xf32>
    %19 = vector.multi_reduction <maximumf>, %18, %cst_19 [1] : vector<8x8xf32> to vector<8xf32>
    %20 = vector.shape_cast %19 : vector<8xf32> to vector<8x1xf32>
    %21 = vector.broadcast %20 : vector<8x1xf32> to vector<8x8xf32>
    %22 = arith.subf %18, %21 : vector<8x8xf32>
    %23 = math.exp %22 : vector<8x8xf32>
    %cst_20 = arith.constant dense<0.000000e+00> : vector<8xf32>
    %24 = vector.multi_reduction <add>, %23, %cst_20 [1] : vector<8x8xf32> to vector<8xf32>
    %25 = vector.shape_cast %24 : vector<8xf32> to vector<8x1xf32>
    %cst_21 = arith.constant 1.000000e+00 : f32
    %26 = vector.broadcast %cst_21 : f32 to vector<8x1xf32>
    %27 = arith.divf %26, %25 : vector<8x1xf32>
    %28 = vector.broadcast %27 : vector<8x1xf32> to vector<8x8xf32>
    %29 = arith.mulf %23, %28 : vector<8x8xf32>
    %cst_22 = arith.constant 0.000000e+00 : f32
    %30 = vector.broadcast %cst_22 : f32 to vector<8x8xf32>
    %31 = arith.select %7, %29, %30 : vector<8x8xi1>, vector<8x8xf32>
    %32 = arith.truncf %31 : vector<8x8xf32> to vector<8x8xbf16>
    %cst_23 = arith.constant dense<0.000000e+00> : vector<8x8xf32>
    %33 = tpu.matmul %32, %9, %cst_23 {dimension_numbers = #tpu.dot_dimension_numbers<[1], [0], [0], [1], [0, 0, 1, 1], [], []>} : vector<8x8xbf16>, vector<8x8xbf16>, vector<8x8xf32> -> vector<8x8xf32>
    %34 = arith.mulf %33, %8 : vector<8x8xf32>
    %cst_24 = arith.constant 0.000000e+00 : f32
    %35 = vector.broadcast %cst_24 : f32 to vector<8x8xf32>
    %36 = arith.maximumf %34, %35 : vector<8x8xf32>
    %37 = math.sqrt %36 : vector<8x8xf32>
    %c0_25 = arith.constant 0 : index
    %38 = memref.load %arg2[%c0_25] : memref<4xf32, #tpu.memory_space<smem>>
    %39 = vector.broadcast %38 : f32 to vector<8x8xf32>
    %40 = arith.mulf %37, %39 : vector<8x8xf32>
    %41 = math.exp %40 : vector<8x8xf32>
    %cst_26 = arith.constant 9.99999974E-6 : f32
    %cst_27 = arith.constant 1.000000e+05 : f32
    %42 = vector.broadcast %cst_26 : f32 to vector<8x8xf32>
    %43 = arith.maximumf %42, %41 : vector<8x8xf32>
    %44 = vector.broadcast %cst_27 : f32 to vector<8x8xf32>
    %45 = arith.minimumf %44, %43 : vector<8x8xf32>
    %46 = arith.mulf %16, %45 : vector<8x8xf32>
    %cst_28 = arith.constant -1.000000e+32 : f32
    %47 = vector.broadcast %cst_28 : f32 to vector<8x8xf32>
    %48 = arith.select %7, %46, %47 : vector<8x8xi1>, vector<8x8xf32>
    %cst_29 = arith.constant dense<0xFF800000> : vector<8xf32>
    %49 = vector.multi_reduction <maximumf>, %48, %cst_29 [1] : vector<8x8xf32> to vector<8xf32>
    %50 = vector.shape_cast %49 : vector<8xf32> to vector<8x1xf32>
    %51 = vector.broadcast %50 : vector<8x1xf32> to vector<8x8xf32>
    %52 = arith.subf %48, %51 : vector<8x8xf32>
    %53 = math.exp %52 : vector<8x8xf32>
    %cst_30 = arith.constant dense<0.000000e+00> : vector<8xf32>
    %54 = vector.multi_reduction <add>, %53, %cst_30 [1] : vector<8x8xf32> to vector<8xf32>
    %55 = vector.shape_cast %54 : vector<8xf32> to vector<8x1xf32>
    %56 = tpu.reciprocal %55 {approx = true} : vector<8x1xf32> -> vector<8x1xf32>
    %57 = vector.broadcast %56 : vector<8x1xf32> to vector<8x8xf32>
    %58 = arith.mulf %53, %57 : vector<8x8xf32>
    %59 = arith.truncf %58 : vector<8x8xf32> to vector<8x8xbf16>
    %cst_31 = arith.constant dense<0.000000e+00> : vector<8x8xf32>
    %60 = tpu.matmul %59, %15, %cst_31 {dimension_numbers = #tpu.dot_dimension_numbers<[1], [0], [0], [1], [0, 0, 1, 1], [], []>} : vector<8x8xbf16>, vector<8x8xbf16>, vector<8x8xf32> -> vector<8x8xf32>
    %c0_32 = arith.constant 0 : index
    %c0_33 = arith.constant 0 : index
    %c0_34 = arith.constant 0 : index
    %61 = vector.load %arg10[%c0_32, %c0_33, %c0_34] : memref<1x8x32xf32, #tpu.memory_space<vmem>>, vector<1x8x8xf32>
    %62 = vector.shape_cast %61 : vector<1x8x8xf32> to vector<8x8xf32>
    %63 = vector.shape_cast %60 : vector<8x8xf32> to vector<1x8x8xf32>
    tpu.vector_store %arg10[%c0_32, %c0_33, %c0_34], %63 {strides = array<i32>} : memref<1x8x32xf32, #tpu.memory_space<vmem>>, vector<1x8x8xf32>,
    %c0_35 = arith.constant 0 : index
    %c0_36 = arith.constant 0 : index
    %c8 = arith.constant 8 : index
    %64 = vector.load %arg3[%c0_35, %c0_36, %c8] : memref<1x8x32xbf16, #tpu.memory_space<vmem>>, vector<1x8x8xbf16>
    %65 = vector.shape_cast %64 : vector<1x8x8xbf16> to vector<8x8xbf16>
    %c0_37 = arith.constant 0 : index
    %c0_38 = arith.constant 0 : index
    %c8_39 = arith.constant 8 : index
    %66 = vector.load %arg4[%c0_37, %c0_38, %c8_39] : memref<1x8x32xbf16, #tpu.memory_space<vmem>>, vector<1x8x8xbf16>
    %67 = vector.shape_cast %66 : vector<1x8x8xbf16> to vector<8x8xbf16>
    %c0_40 = arith.constant 0 : index
    %c0_41 = arith.constant 0 : index
    %c8_42 = arith.constant 8 : index
    %68 = vector.load %arg5[%c0_40, %c0_41, %c8_42] : memref<1x8x32xbf16, #tpu.memory_space<vmem>>, vector<1x8x8xbf16>
    %69 = vector.shape_cast %68 : vector<1x8x8xbf16> to vector<8x8xbf16>
    %cst_43 = arith.constant dense<0.000000e+00> : vector<8x8xf32>
    %70 = tpu.matmul %65, %67, %cst_43 {dimension_numbers = #tpu.dot_dimension_numbers<[1], [1], [0], [0], [0, 0, 1, 0], [], []>} : vector<8x8xbf16>, vector<8x8xbf16>, vector<8x8xf32> -> vector<8x8xf32>
    %cst_44 = arith.constant -1.000000e+32 : f32
    %71 = vector.broadcast %cst_44 : f32 to vector<8x8xf32>
    %72 = arith.select %6, %70, %71 : vector<8x8xi1>, vector<8x8xf32>
    %cst_45 = arith.constant dense<0xFF800000> : vector<8xf32>
    %73 = vector.multi_reduction <maximumf>, %72, %cst_45 [1] : vector<8x8xf32> to vector<8xf32>
    %74 = vector.shape_cast %73 : vector<8xf32> to vector<8x1xf32>
    %75 = vector.broadcast %74 : vector<8x1xf32> to vector<8x8xf32>
    %76 = arith.subf %72, %75 : vector<8x8xf32>
    %77 = math.exp %76 : vector<8x8xf32>
    %cst_46 = arith.constant dense<0.000000e+00> : vector<8xf32>
    %78 = vector.multi_reduction <add>, %77, %cst_46 [1] : vector<8x8xf32> to vector<8xf32>
    %79 = vector.shape_cast %78 : vector<8xf32> to vector<8x1xf32>
    %cst_47 = arith.constant 1.000000e+00 : f32
    %80 = vector.broadcast %cst_47 : f32 to vector<8x1xf32>
    %81 = arith.divf %80, %79 : vector<8x1xf32>
    %82 = vector.broadcast %81 : vector<8x1xf32> to vector<8x8xf32>
    %83 = arith.mulf %77, %82 : vector<8x8xf32>
    %cst_48 = arith.constant 0.000000e+00 : f32
    %84 = vector.broadcast %cst_48 : f32 to vector<8x8xf32>
    %85 = arith.select %7, %83, %84 : vector<8x8xi1>, vector<8x8xf32>
    %86 = arith.truncf %85 : vector<8x8xf32> to vector<8x8xbf16>
    %cst_49 = arith.constant dense<0.000000e+00> : vector<8x8xf32>
    %87 = tpu.matmul %86, %9, %cst_49 {dimension_numbers = #tpu.dot_dimension_numbers<[1], [0], [0], [1], [0, 0, 1, 1], [], []>} : vector<8x8xbf16>, vector<8x8xbf16>, vector<8x8xf32> -> vector<8x8xf32>
    %88 = arith.mulf %87, %8 : vector<8x8xf32>
    %cst_50 = arith.constant 0.000000e+00 : f32
    %89 = vector.broadcast %cst_50 : f32 to vector<8x8xf32>
    %90 = arith.maximumf %88, %89 : vector<8x8xf32>
    %91 = math.sqrt %90 : vector<8x8xf32>
    %c1 = arith.constant 1 : index
    %92 = memref.load %arg2[%c1] : memref<4xf32, #tpu.memory_space<smem>>
    %93 = vector.broadcast %92 : f32 to vector<8x8xf32>
    %94 = arith.mulf %91, %93 : vector<8x8xf32>
    %95 = math.exp %94 : vector<8x8xf32>
    %cst_51 = arith.constant 9.99999974E-6 : f32
    %cst_52 = arith.constant 1.000000e+05 : f32
    %96 = vector.broadcast %cst_51 : f32 to vector<8x8xf32>
    %97 = arith.maximumf %96, %95 : vector<8x8xf32>
    %98 = vector.broadcast %cst_52 : f32 to vector<8x8xf32>
    %99 = arith.minimumf %98, %97 : vector<8x8xf32>
    %100 = arith.mulf %70, %99 : vector<8x8xf32>
    %cst_53 = arith.constant -1.000000e+32 : f32
    %101 = vector.broadcast %cst_53 : f32 to vector<8x8xf32>
    %102 = arith.select %7, %100, %101 : vector<8x8xi1>, vector<8x8xf32>
    %cst_54 = arith.constant dense<0xFF800000> : vector<8xf32>
    %103 = vector.multi_reduction <maximumf>, %102, %cst_54 [1] : vector<8x8xf32> to vector<8xf32>
    %104 = vector.shape_cast %103 : vector<8xf32> to vector<8x1xf32>
    %105 = vector.broadcast %104 : vector<8x1xf32> to vector<8x8xf32>
    %106 = arith.subf %102, %105 : vector<8x8xf32>
    %107 = math.exp %106 : vector<8x8xf32>
    %cst_55 = arith.constant dense<0.000000e+00> : vector<8xf32>
    %108 = vector.multi_reduction <add>, %107, %cst_55 [1] : vector<8x8xf32> to vector<8xf32>
    %109 = vector.shape_cast %108 : vector<8xf32> to vector<8x1xf32>
    %110 = tpu.reciprocal %109 {approx = true} : vector<8x1xf32> -> vector<8x1xf32>
    %111 = vector.broadcast %110 : vector<8x1xf32> to vector<8x8xf32>
    %112 = arith.mulf %107, %111 : vector<8x8xf32>
    %113 = arith.truncf %112 : vector<8x8xf32> to vector<8x8xbf16>
    %cst_56 = arith.constant dense<0.000000e+00> : vector<8x8xf32>
    %114 = tpu.matmul %113, %69, %cst_56 {dimension_numbers = #tpu.dot_dimension_numbers<[1], [0], [0], [1], [0, 0, 1, 1], [], []>} : vector<8x8xbf16>, vector<8x8xbf16>, vector<8x8xf32> -> vector<8x8xf32>
    %c0_57 = arith.constant 0 : index
    %c0_58 = arith.constant 0 : index
    %c8_59 = arith.constant 8 : index
    %115 = vector.load %arg10[%c0_57, %c0_58, %c8_59] : memref<1x8x32xf32, #tpu.memory_space<vmem>>, vector<1x8x8xf32>
    %116 = vector.shape_cast %115 : vector<1x8x8xf32> to vector<8x8xf32>
    %117 = vector.shape_cast %114 : vector<8x8xf32> to vector<1x8x8xf32>
    tpu.vector_store %arg10[%c0_57, %c0_58, %c8_59], %117 {strides = array<i32>} : memref<1x8x32xf32, #tpu.memory_space<vmem>>, vector<1x8x8xf32>,
    %c0_60 = arith.constant 0 : index
    %c0_61 = arith.constant 0 : index
    %c16 = arith.constant 16 : index
    %118 = vector.load %arg3[%c0_60, %c0_61, %c16] : memref<1x8x32xbf16, #tpu.memory_space<vmem>>, vector<1x8x8xbf16>
    %119 = vector.shape_cast %118 : vector<1x8x8xbf16> to vector<8x8xbf16>
    %c0_62 = arith.constant 0 : index
    %c0_63 = arith.constant 0 : index
    %c16_64 = arith.constant 16 : index
    %120 = vector.load %arg4[%c0_62, %c0_63, %c16_64] : memref<1x8x32xbf16, #tpu.memory_space<vmem>>, vector<1x8x8xbf16>
    %121 = vector.shape_cast %120 : vector<1x8x8xbf16> to vector<8x8xbf16>
    %c0_65 = arith.constant 0 : index
    %c0_66 = arith.constant 0 : index
    %c16_67 = arith.constant 16 : index
    %122 = vector.load %arg5[%c0_65, %c0_66, %c16_67] : memref<1x8x32xbf16, #tpu.memory_space<vmem>>, vector<1x8x8xbf16>
    %123 = vector.shape_cast %122 : vector<1x8x8xbf16> to vector<8x8xbf16>
    %cst_68 = arith.constant dense<0.000000e+00> : vector<8x8xf32>
    %124 = tpu.matmul %119, %121, %cst_68 {dimension_numbers = #tpu.dot_dimension_numbers<[1], [1], [0], [0], [0, 0, 1, 0], [], []>} : vector<8x8xbf16>, vector<8x8xbf16>, vector<8x8xf32> -> vector<8x8xf32>
    %cst_69 = arith.constant -1.000000e+32 : f32
    %125 = vector.broadcast %cst_69 : f32 to vector<8x8xf32>
    %126 = arith.select %6, %124, %125 : vector<8x8xi1>, vector<8x8xf32>
    %cst_70 = arith.constant dense<0xFF800000> : vector<8xf32>
    %127 = vector.multi_reduction <maximumf>, %126, %cst_70 [1] : vector<8x8xf32> to vector<8xf32>
    %128 = vector.shape_cast %127 : vector<8xf32> to vector<8x1xf32>
    %129 = vector.broadcast %128 : vector<8x1xf32> to vector<8x8xf32>
    %130 = arith.subf %126, %129 : vector<8x8xf32>
    %131 = math.exp %130 : vector<8x8xf32>
    %cst_71 = arith.constant dense<0.000000e+00> : vector<8xf32>
    %132 = vector.multi_reduction <add>, %131, %cst_71 [1] : vector<8x8xf32> to vector<8xf32>
    %133 = vector.shape_cast %132 : vector<8xf32> to vector<8x1xf32>
    %cst_72 = arith.constant 1.000000e+00 : f32
    %134 = vector.broadcast %cst_72 : f32 to vector<8x1xf32>
    %135 = arith.divf %134, %133 : vector<8x1xf32>
    %136 = vector.broadcast %135 : vector<8x1xf32> to vector<8x8xf32>
    %137 = arith.mulf %131, %136 : vector<8x8xf32>
    %cst_73 = arith.constant 0.000000e+00 : f32
    %138 = vector.broadcast %cst_73 : f32 to vector<8x8xf32>
    %139 = arith.select %7, %137, %138 : vector<8x8xi1>, vector<8x8xf32>
    %140 = arith.truncf %139 : vector<8x8xf32> to vector<8x8xbf16>
    %cst_74 = arith.constant dense<0.000000e+00> : vector<8x8xf32>
    %141 = tpu.matmul %140, %9, %cst_74 {dimension_numbers = #tpu.dot_dimension_numbers<[1], [0], [0], [1], [0, 0, 1, 1], [], []>} : vector<8x8xbf16>, vector<8x8xbf16>, vector<8x8xf32> -> vector<8x8xf32>
    %142 = arith.mulf %141, %8 : vector<8x8xf32>
    %cst_75 = arith.constant 0.000000e+00 : f32
    %143 = vector.broadcast %cst_75 : f32 to vector<8x8xf32>
    %144 = arith.maximumf %142, %143 : vector<8x8xf32>
    %145 = math.sqrt %144 : vector<8x8xf32>
    %c2 = arith.constant 2 : index
    %146 = memref.load %arg2[%c2] : memref<4xf32, #tpu.memory_space<smem>>
    %147 = vector.broadcast %146 : f32 to vector<8x8xf32>
    %148 = arith.mulf %145, %147 : vector<8x8xf32>
    %149 = math.exp %148 : vector<8x8xf32>
    %cst_76 = arith.constant 9.99999974E-6 : f32
    %cst_77 = arith.constant 1.000000e+05 : f32
    %150 = vector.broadcast %cst_76 : f32 to vector<8x8xf32>
    %151 = arith.maximumf %150, %149 : vector<8x8xf32>
    %152 = vector.broadcast %cst_77 : f32 to vector<8x8xf32>
    %153 = arith.minimumf %152, %151 : vector<8x8xf32>
    %154 = arith.mulf %124, %153 : vector<8x8xf32>
    %cst_78 = arith.constant -1.000000e+32 : f32
    %155 = vector.broadcast %cst_78 : f32 to vector<8x8xf32>
    %156 = arith.select %7, %154, %155 : vector<8x8xi1>, vector<8x8xf32>
    %cst_79 = arith.constant dense<0xFF800000> : vector<8xf32>
    %157 = vector.multi_reduction <maximumf>, %156, %cst_79 [1] : vector<8x8xf32> to vector<8xf32>
    %158 = vector.shape_cast %157 : vector<8xf32> to vector<8x1xf32>
    %159 = vector.broadcast %158 : vector<8x1xf32> to vector<8x8xf32>
    %160 = arith.subf %156, %159 : vector<8x8xf32>
    %161 = math.exp %160 : vector<8x8xf32>
    %cst_80 = arith.constant dense<0.000000e+00> : vector<8xf32>
    %162 = vector.multi_reduction <add>, %161, %cst_80 [1] : vector<8x8xf32> to vector<8xf32>
    %163 = vector.shape_cast %162 : vector<8xf32> to vector<8x1xf32>
    %164 = tpu.reciprocal %163 {approx = true} : vector<8x1xf32> -> vector<8x1xf32>
    %165 = vector.broadcast %164 : vector<8x1xf32> to vector<8x8xf32>
    %166 = arith.mulf %161, %165 : vector<8x8xf32>
    %167 = arith.truncf %166 : vector<8x8xf32> to vector<8x8xbf16>
    %cst_81 = arith.constant dense<0.000000e+00> : vector<8x8xf32>
    %168 = tpu.matmul %167, %123, %cst_81 {dimension_numbers = #tpu.dot_dimension_numbers<[1], [0], [0], [1], [0, 0, 1, 1], [], []>} : vector<8x8xbf16>, vector<8x8xbf16>, vector<8x8xf32> -> vector<8x8xf32>
    %c0_82 = arith.constant 0 : index
    %c0_83 = arith.constant 0 : index
    %c16_84 = arith.constant 16 : index
    %169 = vector.load %arg10[%c0_82, %c0_83, %c16_84] : memref<1x8x32xf32, #tpu.memory_space<vmem>>, vector<1x8x8xf32>
    %170 = vector.shape_cast %169 : vector<1x8x8xf32> to vector<8x8xf32>
    %171 = vector.shape_cast %168 : vector<8x8xf32> to vector<1x8x8xf32>
    tpu.vector_store %arg10[%c0_82, %c0_83, %c16_84], %171 {strides = array<i32>} : memref<1x8x32xf32, #tpu.memory_space<vmem>>, vector<1x8x8xf32>,
    %c0_85 = arith.constant 0 : index
    %c0_86 = arith.constant 0 : index
    %c24 = arith.constant 24 : index
    %172 = vector.load %arg3[%c0_85, %c0_86, %c24] : memref<1x8x32xbf16, #tpu.memory_space<vmem>>, vector<1x8x8xbf16>
    %173 = vector.shape_cast %172 : vector<1x8x8xbf16> to vector<8x8xbf16>
    %c0_87 = arith.constant 0 : index
    %c0_88 = arith.constant 0 : index
    %c24_89 = arith.constant 24 : index
    %174 = vector.load %arg4[%c0_87, %c0_88, %c24_89] : memref<1x8x32xbf16, #tpu.memory_space<vmem>>, vector<1x8x8xbf16>
    %175 = vector.shape_cast %174 : vector<1x8x8xbf16> to vector<8x8xbf16>
    %c0_90 = arith.constant 0 : index
    %c0_91 = arith.constant 0 : index
    %c24_92 = arith.constant 24 : index
    %176 = vector.load %arg5[%c0_90, %c0_91, %c24_92] : memref<1x8x32xbf16, #tpu.memory_space<vmem>>, vector<1x8x8xbf16>
    %177 = vector.shape_cast %176 : vector<1x8x8xbf16> to vector<8x8xbf16>
    %cst_93 = arith.constant dense<0.000000e+00> : vector<8x8xf32>
    %178 = tpu.matmul %173, %175, %cst_93 {dimension_numbers = #tpu.dot_dimension_numbers<[1], [1], [0], [0], [0, 0, 1, 0], [], []>} : vector<8x8xbf16>, vector<8x8xbf16>, vector<8x8xf32> -> vector<8x8xf32>
    %cst_94 = arith.constant -1.000000e+32 : f32
    %179 = vector.broadcast %cst_94 : f32 to vector<8x8xf32>
    %180 = arith.select %6, %178, %179 : vector<8x8xi1>, vector<8x8xf32>
    %cst_95 = arith.constant dense<0xFF800000> : vector<8xf32>
    %181 = vector.multi_reduction <maximumf>, %180, %cst_95 [1] : vector<8x8xf32> to vector<8xf32>
    %182 = vector.shape_cast %181 : vector<8xf32> to vector<8x1xf32>
    %183 = vector.broadcast %182 : vector<8x1xf32> to vector<8x8xf32>
    %184 = arith.subf %180, %183 : vector<8x8xf32>
    %185 = math.exp %184 : vector<8x8xf32>
    %cst_96 = arith.constant dense<0.000000e+00> : vector<8xf32>
    %186 = vector.multi_reduction <add>, %185, %cst_96 [1] : vector<8x8xf32> to vector<8xf32>
    %187 = vector.shape_cast %186 : vector<8xf32> to vector<8x1xf32>
    %cst_97 = arith.constant 1.000000e+00 : f32
    %188 = vector.broadcast %cst_97 : f32 to vector<8x1xf32>
    %189 = arith.divf %188, %187 : vector<8x1xf32>
    %190 = vector.broadcast %189 : vector<8x1xf32> to vector<8x8xf32>
    %191 = arith.mulf %185, %190 : vector<8x8xf32>
    %cst_98 = arith.constant 0.000000e+00 : f32
    %192 = vector.broadcast %cst_98 : f32 to vector<8x8xf32>
    %193 = arith.select %7, %191, %192 : vector<8x8xi1>, vector<8x8xf32>
    %194 = arith.truncf %193 : vector<8x8xf32> to vector<8x8xbf16>
    %cst_99 = arith.constant dense<0.000000e+00> : vector<8x8xf32>
    %195 = tpu.matmul %194, %9, %cst_99 {dimension_numbers = #tpu.dot_dimension_numbers<[1], [0], [0], [1], [0, 0, 1, 1], [], []>} : vector<8x8xbf16>, vector<8x8xbf16>, vector<8x8xf32> -> vector<8x8xf32>
    %196 = arith.mulf %195, %8 : vector<8x8xf32>
    %cst_100 = arith.constant 0.000000e+00 : f32
    %197 = vector.broadcast %cst_100 : f32 to vector<8x8xf32>
    %198 = arith.maximumf %196, %197 : vector<8x8xf32>
    %199 = math.sqrt %198 : vector<8x8xf32>
    %c3 = arith.constant 3 : index
    %200 = memref.load %arg2[%c3] : memref<4xf32, #tpu.memory_space<smem>>
    %201 = vector.broadcast %200 : f32 to vector<8x8xf32>
    %202 = arith.mulf %199, %201 : vector<8x8xf32>
    %203 = math.exp %202 : vector<8x8xf32>
    %cst_101 = arith.constant 9.99999974E-6 : f32
    %cst_102 = arith.constant 1.000000e+05 : f32
    %204 = vector.broadcast %cst_101 : f32 to vector<8x8xf32>
    %205 = arith.maximumf %204, %203 : vector<8x8xf32>
    %206 = vector.broadcast %cst_102 : f32 to vector<8x8xf32>
    %207 = arith.minimumf %206, %205 : vector<8x8xf32>
    %208 = arith.mulf %178, %207 : vector<8x8xf32>
    %cst_103 = arith.constant -1.000000e+32 : f32
    %209 = vector.broadcast %cst_103 : f32 to vector<8x8xf32>
    %210 = arith.select %7, %208, %209 : vector<8x8xi1>, vector<8x8xf32>
    %cst_104 = arith.constant dense<0xFF800000> : vector<8xf32>
    %211 = vector.multi_reduction <maximumf>, %210, %cst_104 [1] : vector<8x8xf32> to vector<8xf32>
    %212 = vector.shape_cast %211 : vector<8xf32> to vector<8x1xf32>
    %213 = vector.broadcast %212 : vector<8x1xf32> to vector<8x8xf32>
    %214 = arith.subf %210, %213 : vector<8x8xf32>
    %215 = math.exp %214 : vector<8x8xf32>
    %cst_105 = arith.constant dense<0.000000e+00> : vector<8xf32>
    %216 = vector.multi_reduction <add>, %215, %cst_105 [1] : vector<8x8xf32> to vector<8xf32>
    %217 = vector.shape_cast %216 : vector<8xf32> to vector<8x1xf32>
    %218 = tpu.reciprocal %217 {approx = true} : vector<8x1xf32> -> vector<8x1xf32>
    %219 = vector.broadcast %218 : vector<8x1xf32> to vector<8x8xf32>
    %220 = arith.mulf %215, %219 : vector<8x8xf32>
    %221 = arith.truncf %220 : vector<8x8xf32> to vector<8x8xbf16>
    %cst_106 = arith.constant dense<0.000000e+00> : vector<8x8xf32>
    %222 = tpu.matmul %221, %177, %cst_106 {dimension_numbers = #tpu.dot_dimension_numbers<[1], [0], [0], [1], [0, 0, 1, 1], [], []>} : vector<8x8xbf16>, vector<8x8xbf16>, vector<8x8xf32> -> vector<8x8xf32>
    %c0_107 = arith.constant 0 : index
    %c0_108 = arith.constant 0 : index
    %c24_109 = arith.constant 24 : index
    %223 = vector.load %arg10[%c0_107, %c0_108, %c24_109] : memref<1x8x32xf32, #tpu.memory_space<vmem>>, vector<1x8x8xf32>
    %224 = vector.shape_cast %223 : vector<1x8x8xf32> to vector<8x8xf32>
    %225 = vector.shape_cast %222 : vector<8x8xf32> to vector<1x8x8xf32>
    tpu.vector_store %arg10[%c0_107, %c0_108, %c24_109], %225 {strides = array<i32>} : memref<1x8x32xf32, #tpu.memory_space<vmem>>, vector<1x8x8xf32>,
    %c0_i32 = arith.constant 0 : i32
    %226 = arith.cmpi eq, %arg1, %c0_i32 : i32
    %227 = arith.extui %226 : i1 to i32
    %c0_i32_110 = arith.constant 0 : i32
    %228 = arith.cmpi ne, %227, %c0_i32_110 : i32
    scf.if %228 {
      %cst_111 = arith.constant 0.000000e+00 : f32
      %229 = vector.broadcast %cst_111 : f32 to vector<1x32xf32>
      %c0_112 = arith.constant 0 : index
      %c0_113 = arith.constant 0 : index
      %c0_114 = arith.constant 0 : index
      %230 = vector.load %arg10[%c0_112, %c0_113, %c0_114] : memref<1x8x32xf32, #tpu.memory_space<vmem>>, vector<1x1x32xf32>
      %231 = vector.shape_cast %230 : vector<1x1x32xf32> to vector<1x32xf32>
      %232 = vector.shape_cast %229 : vector<1x32xf32> to vector<1x1x32xf32>
      tpu.vector_store %arg10[%c0_112, %c0_113, %c0_114], %232 {strides = array<i32>} : memref<1x8x32xf32, #tpu.memory_space<vmem>>, vector<1x1x32xf32>,
    } else {
    }
    return
  }
  func.func @transform_0(%arg0: i32, %arg1: i32) -> i32 {
    %c0_i32 = arith.constant 0 : i32
    %c0_i32_0 = arith.constant 0 : i32
    return %c0_i32 : i32
  }
  func.func @transform_1(%arg0: i32, %arg1: i32) -> (i32, i32, i32) {
    %c0_i32 = arith.constant 0 : i32
    %c0_i32_0 = arith.constant 0 : i32
    return %arg0, %arg1, %c0_i32 : i32, i32, i32
  }
  func.func @transform_2(%arg0: i32, %arg1: i32) -> (i32, i32, i32) {
    %c0_i32 = arith.constant 0 : i32
    %c0_i32_0 = arith.constant 0 : i32
    %c0_i32_1 = arith.constant 0 : i32
    return %arg0, %c0_i32, %c0_i32_0 : i32, i32, i32
  }
  func.func @transform_3(%arg0: i32, %arg1: i32) -> (i32, i32, i32) {
    %c0_i32 = arith.constant 0 : i32
    %c0_i32_0 = arith.constant 0 : i32
    %c0_i32_1 = arith.constant 0 : i32
    return %arg0, %c0_i32, %c0_i32_0 : i32, i32, i32
  }
  func.func @transform_4(%arg0: i32, %arg1: i32) -> (i32, i32) {
    %c0_i32 = arith.constant 0 : i32
    %c0_i32_0 = arith.constant 0 : i32
    return %arg1, %c0_i32 : i32, i32
  }
  func.func @transform_5(%arg0: i32, %arg1: i32) -> (i32, i32, i32) {
    %c0_i32 = arith.constant 0 : i32
    %c0_i32_0 = arith.constant 0 : i32
    return %arg0, %arg1, %c0_i32 : i32, i32, i32
  }
  func.func @transform_6(%arg0: i32, %arg1: i32) -> (i32, i32) {
    %c0_i32 = arith.constant 0 : i32
    %c0_i32_0 = arith.constant 0 : i32
    return %arg1, %c0_i32 : i32, i32
  }
  func.func @transform_7(%arg0: i32, %arg1: i32) -> (i32, i32) {
    %c0_i32 = arith.constant 0 : i32
    %c0_i32_0 = arith.constant 0 : i32
    %c0_i32_1 = arith.constant 0 : i32
    return %c0_i32, %c0_i32_0 : i32, i32
  }
  func.func @transform_8(%arg0: i32, %arg1: i32) -> (i32, i32, i32) {
    %c0_i32 = arith.constant 0 : i32
    %c0_i32_0 = arith.constant 0 : i32
    return %arg0, %arg1, %c0_i32 : i32, i32, i32
  }
}

</mosaic_0001>

<bundles_post_ra>
// kernel: tpu_custom_call.1
= control target key start
LH: loop header
LB: loop body
LE: loop exit
PB: predicated region body
PF: predicated region fallthrough
CT: control target
= control target key end

     0   :  { %s2562_s0 = inlined_call_operand.hbm [shape: f32[4], index: 0, kind: input, shape index: {}]   ;;  %s2563_s1 = inlined_call_operand.hbm [shape: bf16[2,8,32], index: 1, kind: input, shape index: {}]   ;;  %s2564_s2 = inlined_call_operand.hbm [shape: bf16[2,8,32], index: 2, kind: input, shape index: {}]   ;;  %s2565_s3 = inlined_call_operand.hbm [shape: bf16[2,8,32], index: 3, kind: input, shape index: {}]   ;;  %s2566_s4 = inlined_call_operand.hbm [shape: s8[8,8], index: 4, kind: input, shape index: {}]   ;;  %s2567_s5 = inlined_call_operand.hbm [shape: s8[2,8,8], index: 5, kind: input, shape index: {}]   ;;  %s2568_s6 = inlined_call_operand.vmem [shape: f32[8,8], index: 6, kind: input, shape index: {}]   ;;  %s2569_s7 = inlined_call_operand.vmem [shape: bf16[8,8], index: 7, kind: input, shape index: {}]   ;;  %s2570_s8 = inlined_call_operand.hbm [shape: f32[2,8,32], index: 8, kind: output, shape index: {}]  }
   0x1   :  { %2579 = sst [smem:[#allocation25_spill]] %s2563_s1 }
   0x2   :  { %2580 = sst [smem:[#allocation26_spill]] %s2564_s2 }
   0x3   :  { %13 = vsyncpa [#allocation5], 0 }
   0x4   :  { %14 = vsyncpa [#allocation3], 0 }
   0x5   :  { %16 = vsyncpa [#allocation3 + $0x1], 0 }
   0x6   :  { %17 = vsyncpa [#allocation8], 0 }
   0x7   :  { %19 = vsyncpa [#allocation8 + $0x1], 0 }
   0x8   :  { %20 = vsyncpa [#allocation11], 0 }
   0x9   :  { %21 = vsyncpa [#allocation4], 0 }
   0xa   :  { %23 = vsyncpa [#allocation4 + $0x1], 0  ;;  %s2135_s27 = smov 0   ;;  %s2137_s28 = smov 0  }
   0xb   :  { %s2139_s29 = smov 0   ;;  %s2141_s30 = smov 0  }
   0xc   :  { %s2143_s9 = smov 0   ;;  %s2145_s10 = smov 0  }
   0xd LB: > { %2581 = sst [smem:[#allocation20_spill]] %s2052_s27  ;;  %s41_s11 = sadd.s32 1, %s2068_s9  ;;  %s2072_s10 = sphi %s2145_s10, %s29_s10   ;;  %s2068_s9 = sphi %s2143_s9, %s2612_s9   ;;  %s2064_s30 = sphi %s2141_s30, %s2611_s30   ;;  %s2060_s29 = sphi %s2139_s29, %s2610_s29   ;;  %s2056_s28 = sphi %s2137_s28, %s2609_s28   ;;  %s2052_s27 = sphi %s2135_s27, %s2608_s27  }
   0xe   : > { %2582 = sst [smem:[#allocation21_spill]] %s2072_s10  ;;  %s71_s12 = sadd.s32 1, %s2060_s29 }
   0xf   : > { %p43_p0 = scmp.ge.s32.totalorder %s41_s11, 2  ;;  %p78_p1 = scmp.ne.s32.totalorder %s2060_s29, %s2056_s28 }
  0x10   : > { %p79_p2 = scmp.eq.s32.totalorder %s2072_s10, 0  ;;  %p1707_p5 = scmp.lt.s32.totalorder %s2072_s10, 2 }
  0x11   : > { %s2614_s11 = smov (%p43_p0, %s41_s11), 0  ;;  %s2572_s14 = sand.u32 1, %s2072_s10  }
  0x12   : > { %2583 = sst [smem:[#allocation22_spill]] %s2614_s11  ;;  %p80_p4 = por %p79_p2, %p78_p1 }
  0x13   : > { %s66_s13 = ssub.s32 %s2068_s9, %s2614_s11  ;;  %s2571_s15 = sand.u32 1, %s2060_s29  }
  0x14   : > { %p69_p6 = scmp.eq.s32.totalorder %s66_s13, 0  ;;  %s2182_s16 = sshll.u32 %s2068_s9, 6 }
  0x15   : > { %s2189_s18 = sshll.u32 %s2571_s15, 2  ;;  %s2585_s1 = sld [smem:[#allocation25_spill]] }
  0x16   : > { %s2185_s17 = scalar_select %p69_p6, %s2060_s29, %s71_s12  }
  0x17   : > { %p2195_p7 = pnand %p1707_p5, %p80_p4  ;;  %s325_s23 = scalar_lea.vmem [#allocation6], %s2189_s18 }
  0x18   : > { %2584 = sst [smem:[#allocation23_spill]] %s2185_s17  ;;  %s333_s24 = sshll.u32 %s325_s23, 4  ;;  %s334_s24 = int_to_ptr.vmem [resolvable:$true] %s333_s24 }
  0x19   : > { %s2202_s25 = scalar_lea.sflag [#allocation3], %s2572_s14  ;;  %p1829_p8 = pneg %p2195_p7 }
  0x1a   : > { %s1840_s26 = scalar_lea.vmem %s334_s24, 64  ;;  %s2074_s12 = smov [#allocation6]  }
  0x1b   : > { %s331_s21 = scalar_lea.hbm %s2585_s1, %s2182_s16  ;;  %p1841_p9 = scmp.ne.s32.totalorder %s334_s24, %s1840_s26 }
  0x1c   : > { %s1845_s13 = sshll.u32 %s2074_s12, 4  ;;  %s1846_s13 = int_to_ptr.vmem [resolvable:$false] %s1845_s13 }
  0x1d   : > { %p1843_p10 = pnand %p1841_p9, %p1829_p8  ;;  %s1847_s19 = scalar_lea.vmem %s1846_s13, 128 }
  0x1e   : > { %p1848_p12 = scmp.lt.s32.totalorder %s334_s24, %s1846_s13  ;;  %p1849_p13 = scmp.lt.s32.totalorder %s1847_s19, %s1840_s26 }
  0x1f   : > { %p1844_p11 = pneg %p1843_p10 }
  0x20   : > { %p1850_p0 = por %p1849_p13, %p1848_p12 }
  0x22   : > { %p1851_p2 = pnand %p1850_p0, %p1844_p11 }
  0x24   : > { %1854 = shalt.err (!%p1851_p2)
}
  0x25   : > { %1691 = dma.hbm_to_vmem [thread:$0]  (!%p2195_p7), %s331_s21, 64, %s334_s24, %s2202_s25  }
  0x26   : > { %s2587_s2 = sld [smem:[#allocation26_spill]]  ;;  %s344_s12 = scalar_lea.vmem [#allocation7], %s2189_s18 }
  0x27   : > { %s351_s14 = sshll.u32 %s344_s12, 4  ;;  %s2588_s13 = sand.u32 1, %s2072_s10   ;;  %s352_s14 = int_to_ptr.vmem [resolvable:$true] %s351_s14 }
  0x28   : > { %s2219_s26 = scalar_lea.sflag [#allocation8], %s2588_s13  ;;  %s1868_s19 = scalar_lea.vmem %s352_s14, 64 }
  0x29   : > { %p1869_p4 = scmp.ne.s32.totalorder %s352_s14, %s1868_s19  ;;  %s2075_s1 = smov [#allocation7]  }
  0x2a   : > { %s1873_s11 = sshll.u32 %s2075_s1, 4  ;;  %s1874_s11 = int_to_ptr.vmem [resolvable:$false] %s1873_s11 }
  0x2b   : > { %p1871_p5 = pnand %p1869_p4, %p1829_p8  ;;  %s1875_s21 = scalar_lea.vmem %s1874_s11, 128 }
  0x2c   : > { %s349_s15 = scalar_lea.hbm %s2587_s2, %s2182_s16  ;;  %p1876_p9 = scmp.lt.s32.totalorder %s352_s14, %s1874_s11 }
  0x2d   : > { %p1872_p6 = pneg %p1871_p5  ;;  %p1877_p10 = scmp.lt.s32.totalorder %s1875_s21, %s1868_s19 }
  0x2f   : > { %p1878_p11 = por %p1877_p10, %p1876_p9 }
  0x31   : > { %p1879_p12 = pnand %p1878_p11, %p1872_p6 }
  0x33   : > { %1882 = shalt.err (!%p1879_p12)
}
  0x34   : > { %1694 = dma.hbm_to_vmem [thread:$0]  (!%p2195_p7), %s349_s15, 64, %s352_s14, %s2219_s26  }
  0x35   : > { %s2228_s1 = sadd.s32 4294967295, %s2072_s10   ;;  %s1517_s11 = sadd.s32 4294967294, %s2072_s10  }
  0x36   : > { %p84_p13 = scmp.ne.s32.totalorder %s2056_s28, %s2052_s27  ;;  %p85_p0 = scmp.eq.s32.totalorder %s2228_s1, 0 }
  0x37   : > { %p263_p2 = scmp.eq.s32.totalorder %s2228_s1, 1  ;;  %p269_p4 = scmp.eq.s32.totalorder %s1517_s11, 1 }
  0x38   : > { %p2237_p5 = por %p85_p0, %p84_p13  ;;  %p1518_p6 = scmp.ge.s32.totalorder %s2072_s10, 1 }
  0x39   : > { %p2245_p9 = por %p263_p2, %p78_p1  ;;  %p2249_p10 = por %p269_p4, %p84_p13 }
  0x3a   : > { %p276_p11 = scmp.lt.s32.totalorder %s2072_s10, 3  ;;  %s2076_s23 = smov [#allocation10]  }
  0x3b   : > { %s2590_s14 = scalar_select %p2245_p9, 1, 0 }
  0x3c   : > { %s2591_s15 = scalar_select %p2249_p10, 1, 0 }
  0x3d   : > { %p2254_p12 = pnand %p1518_p6, %p276_p11  ;;  %s300_s12 = sshll.u32 %s2076_s23, 4  ;;  %s2258_s12 = int_to_ptr.vmem [resolvable:$true] %s300_s12 }
  0x3e   : > { %2592 = sst [smem:[#allocation24_spill]] %s2591_s15  ;;  %s367_s21 = scalar_lea.hbm %s2565_s3, %s2182_s16 }
  0x3f   : > { %p1681_p1 = pneg %p2254_p12  ;;  %s362_s11 = scalar_lea.vmem [#allocation9], %s2189_s18 }
  0x40   : > { %s369_s2 = sshll.u32 %s362_s11, 4  ;;  %s2594_s17 = sand.u32 1, %s2060_s29   ;;  %s370_s2 = int_to_ptr.vmem [resolvable:$true] %s369_s2 }
  0x41   : > { %s2269_s15 = sshll.u32 %s2594_s17, 1  ;;  %p2273_p13 = pnand %p1681_p1, %p85_p0 }
  0x42   : > { %s1896_s23 = scalar_lea.vmem %s370_s2, 64  ;;  %s2077_s27 = smov [#allocation9]  }
  0x43   : > { %p1897_p2 = scmp.ne.s32.totalorder %s370_s2, %s1896_s23  ;;  %s1901_s13 = sshll.u32 %s2077_s27, 4  ;;  %s1902_s13 = int_to_ptr.vmem [resolvable:$false] %s1901_s13 }
  0x44   : > { %s1903_s16 = scalar_lea.vmem %s1902_s13, 128  ;;  %p1904_p11 = scmp.lt.s32.totalorder %s370_s2, %s1902_s13 }
  0x45   : > { %p1899_p4 = pnand %p1897_p2, %p1829_p8  ;;  %p1905_p3 = scmp.lt.s32.totalorder %s1903_s16, %s1896_s23 }
  0x47   : > { %p1900_p6 = pneg %p1899_p4  ;;  %p1906_p10 = por %p1905_p3, %p1904_p11 }
  0x49   : > { %p1907_p9 = pnand %p1906_p10, %p1900_p6 }
  0x4b   : > { %1910 = shalt.err (!%p1907_p9)
}
  0x4c   : > { %1697 = dma.hbm_to_vmem [thread:$0]  (!%p2195_p7), %s367_s21, 64, %s370_s2, %s2219_s26  }
  0x4d   : > { %s2078_s17 = smov [#allocation2]   ;;  %p1924_p1 = pneg %p2273_p13 }
  0x4e   : > { %1684 = dma.hbm_to_smem (!%p2273_p13), %s2562_s0, 16, %s2078_s17, [#allocation5]  }
  0x4f   : > { %s1933_s19 = scalar_lea.vmem %s2258_s12, 32  ;;  %p1941_p2 = scmp.lt.s32.totalorder %s2258_s12, %s2258_s12 }
  0x50   : > { %p1934_p3 = scmp.ne.s32.totalorder %s2258_s12, %s1933_s19  ;;  %p1942_p4 = scmp.lt.s32.totalorder %s1933_s19, %s1933_s19 }
  0x52   : > { %p1936_p9 = pnand %p1934_p3, %p1924_p1  ;;  %p1943_p6 = por %p1942_p4, %p1941_p2 }
  0x54   : > { %p1937_p10 = pneg %p1936_p9 }
  0x56   : > { %p1944_p11 = pnand %p1943_p6, %p1937_p10 }
  0x58   : > { %1947 = shalt.err (!%p1944_p11)
}
  0x59   : > { %1687 = dma.hbm_to_vmem [thread:$0]  (!%p2273_p13), %s2566_s4, 32, %s2258_s12, [#allocation11]  }
  0x5a   : > { %s1530_s21 = sshll.u32 %s2068_s9, 5  ;;  %s380_s11 = scalar_lea.vmem [#allocation12], %s2269_s15 }
  0x5b   : > { %s388_s23 = sshll.u32 %s380_s11, 4  ;;  %s386_s17 = scalar_lea.hbm %s2567_s5, %s1530_s21  ;;  %s389_s23 = int_to_ptr.vmem [resolvable:$true] %s388_s23 }
  0x5c   : > { %s1961_s18 = scalar_lea.vmem %s389_s23, 32  ;;  %s2079_s10 = smov [#allocation12]  }
  0x5d   : > { %p1962_p1 = scmp.ne.s32.totalorder %s389_s23, %s1961_s18  ;;  %s1966_s27 = sshll.u32 %s2079_s10, 4  ;;  %s1967_s27 = int_to_ptr.vmem [resolvable:$false] %s1966_s27 }
  0x5e   : > { %s1968_s19 = scalar_lea.vmem %s1967_s27, 64  ;;  %p1969_p10 = scmp.lt.s32.totalorder %s389_s23, %s1967_s27 }
  0x5f   : > { %p1964_p3 = pnand %p1962_p1, %p1829_p8  ;;  %p1970_p13 = scmp.lt.s32.totalorder %s1968_s19, %s1961_s18 }
  0x61   : > { %p1965_p9 = pneg %p1964_p3  ;;  %p1971_p2 = por %p1970_p13, %p1969_p10 }
  0x63   : > { %p1972_p4 = pnand %p1971_p2, %p1965_p9 }
  0x65   : > { %1975 = shalt.err (!%p1972_p4)
}
  0x66   : > { %1700 = dma.hbm_to_vmem [thread:$0]  (!%p2195_p7), %s386_s17, 32, %s389_s23, %s2202_s25  }
  0x67   : > { %397 = sbr.rel (%p2254_p12) target bundleno = 3202 (0xc82), region = 52 }
  0x6c   : > { %2027 = dma.done.wait (%p85_p0), [#allocation5], 16  }
  0x6d   : > { %2029 = vsyncadd (%p85_p0), [#allocation5], 4294967280  ;;  %s403_s15 = sand.u32 1, %s2228_s1   ;;  %s2319_s12 = sand.u32 1, %s2056_s28  }
  0x6e   : > { %s1533_s2 = sshll.u32 %s2319_s12, 2  ;;  %s404_s22 = scalar_lea.sflag [#allocation3], %s403_s15 }
  0x6f   : > { %s2322_s26 = scalar_lea.vmem [#allocation6], %s1533_s2 }
  0x70   : > { %2031 = dma.done.wait (%p2237_p5), %s404_s22, 64  }
  0x71   : > { %2033 = vsyncadd (%p2237_p5), %s404_s22, 4294967232  ;;  %s413_s25 = scalar_lea.sflag [#allocation8], %s403_s15  ;;  %s2328_s20 = scalar_lea.vmem [#allocation7], %s1533_s2 }
  0x72   : > { %2035 = dma.done.wait (%p2237_p5), %s413_s25, 128  }
  0x73   : > { %2037 = vsyncadd (%p2237_p5), %s413_s25, 4294967168  ;;  %s2334_s21 = scalar_lea.vmem [#allocation9], %s1533_s2 }
  0x74   : > { %2039 = dma.done.wait (%p85_p0), [#allocation11], 32  }
  0x75   : > { %2041 = vsyncadd (%p85_p0), [#allocation11], 4294967264  ;;  %s1537_s11 = sshll.u32 %s2319_s12, 1 }
  0x76   : > { %s438_s23 = scalar_lea.vmem [#allocation12], %s1537_s11 }
  0x77   : > { %2043 = dma.done.wait (%p2237_p5), %s404_s22, 32  }
  0x78   : > { %2045 = vsyncadd (%p2237_p5), %s404_s22, 4294967264 }
  0x79   : > { %443 = sfence }
  0x7a   : > { %v506_v0 = vld [vmem:[%s2328_s20] sm:$0xf]  ;;  %vm508_vm0 = vcmask 64512   ;;  %v2080_v1 = vmov 0.0   ;;  %vm2081_vm1 = vmmov 0   ;;  %v2082_v6 = vmov 0  }
  0x7b   : > { %1591 = vmatprep.subr.bf16.mxu0 %v2080_v1  ;;  %v513_v2 = vsel %vm508_vm0, %v506_v0, 0  ;;  %1593 = vmatprep.mubr.msk.bf16.mxu0 %vm2081_vm1, %v2080_v1  ;;  %v505_v3 = vld [vmem:[%s2322_s26] sm:$0xf]  ;;  %v500_v4 = vld [vmem:[%s438_s23] sm:$0x3]  ;;  %s2083_s1 = smov 120  }
  0x7c   : > { %1592 = vmatpush3.bf16.xpose.msra.mxu0 %v513_v2  ;;  %1597 = vmatprep.subr.bf16.mxu1 %v2080_v1  ;;  %v498_v5 = vld [vmem:[#allocation10] sm:$0x3]  ;;  %vm501_vm2 = vnez %v500_v4  ;;  %v1770_v8 = vld [vmem:[%s2328_s20] ss:$0 sps:$4 sm:$0xff]   ;;  %v1771_v9 = vld [vmem:[%s2322_s26] ss:$0 sps:$4 sm:$0xff]  }
  0x7d   : > { %1609 = vmatprep.subr.bf16.mxu0 %v2080_v1  ;;  %1599 = vmatprep.mubr.msk.bf16.mxu1 %vm2081_vm1, %v2080_v1  ;;  %vm499_vm3 = vnez %v498_v5  ;;  %v555_v10 = vsel %vm501_vm2, 16843009, %v2082_v6  ;;  %v504_v27 = vld [vmem:[%s2569_s7] sm:$0xf]  ;;  %vm579_vm6 = vcmask 1043456   ;;  %s632_s18 = sld [smem:[#allocation2]] }
  0x7e   : > { %vm502_vm4 = vmand %vm499_vm3, %vm501_vm2  ;;  %711 = vrot.lane.b32.xlu1 %v1770_v8, %s2083_s1  ;;  %v556_v11 = vunpack.c.0.s8 %v555_v10  ;;  %v2382_v28 = vsel %vm579_vm6, %v504_v27, 0  ;;  %v2404_v42 = vld [vmem:[%s2568_s6] sm:$0xff]  ;;  %s2084_s10 = smov 112   ;;  %s1538_s27 = sshll.u32 %s2319_s12, 3  ;;  %vm902_vm14 = vcmask 130112   ;;  %vm1106_vm2 = vcmask 195712  }
  0x7f   : > { %v571_v7 = vsel %vm502_vm4, 16843009, %v2082_v6  ;;  %1598 = vmatpush3.bf16.msra.mxu1 %v2382_v28  ;;  %v507_v10 = vld [vmem:[%s2334_s21] sm:$0xf]  ;;  %s2436_s19 = scalar_lea.vmem [#allocation13], %s1538_s27  ;;  %s1546_s15 = sld [smem:[#allocation2 + $0x1]] }
  0x80   : > { %vm2362_vm5 = vcmp.ne.s32.totalorder %v556_v11, 0  ;;  %1603 = vmatprep.subr.bf16.mxu1 %v2080_v1  ;;  %v572_v36 = vunpack.c.0.s8 %v571_v7  ;;  %v657_v11 = vsel %vm579_vm6, %v507_v10, 0  ;;  %s2085_s2 = smov 104   ;;  %s1553_s22 = sld [smem:[#allocation2 + $0x2]]  ;;  %vm1310_vm3 = vcmask 261312  }
  0x81   : > { %s2087_s25 = smov 16   ;;  %s1564_s11 = sshll.u32 %s2064_s30, 7  ;;  %vm1316_vm4 = vcmask 253952  }
  0x82   : > { %706 = vrot.lane.b32.xlu1 %v1771_v9, %s2083_s1  ;;  %vm2392_vm7 = vcmp.ne.s32.totalorder %v572_v36, 0  ;;  %s1333_s23 = sshll.u32 %s2436_s19, 4  ;;  %s2517_s13 = scalar_lea.hbm %s2570_s8, %s1564_s11  ;;  %s1334_s23 = int_to_ptr.vmem [resolvable:$true] %s1333_s23 }
  0x83   : > { %1594 = vmatmul.mubr.msk.bf16.vlgmr.msra.gmra.mxu0 %vm508_vm0, %v505_v3  ;;  %v633_v52 = vstv %s632_s18  ;;  %s1319_s16 = scalar_lea.sflag [#allocation4], %s2319_s12  ;;  %s1976_s17 = scalar_lea.vmem %s1334_s23, 128 }
  0x84   : > { %1611 = vmatprep.mubr.msk.bf16.mxu0 %vm2081_vm1, %v2080_v1  ;;  %p1977_p7 = scmp.ne.s32.totalorder %s1334_s23, %s1976_s17  ;;  %p2600_p8 = scmp.ne.s32.totalorder %s2590_s14, 0 }
  0x85   : > { %s2089_s30 = smov [#allocation13]  }
  0x86   : > { %p1978_p0 = pnand %p1977_p7, %p2600_p8  ;;  %s1980_s18 = sshll.u32 %s2089_s30, 4  ;;  %s1981_s18 = int_to_ptr.vmem [resolvable:$false] %s1980_s18 }
  0x87   : > { %p1983_p12 = scmp.lt.s32.totalorder %s1334_s23, %s1981_s18 }
  0x88   : > { %p1979_p5 = pneg %p1978_p0 }
  0xf0   : > { %v712_v19 = vpop.permute.xlu1 %711 }
  0xf1   : > { %v717_v20 = vsel %vm508_vm0, %v712_v19, 0 }
  0xf2   : > { %1610 = vmatpush3.bf16.xpose.msra.mxu0 %v717_v20 }
  0xf3   : > { %1621 = vmatprep.subr.bf16.mxu0 %v2080_v1 }
  0xf4   : > { %v707_v21 = vpop.permute.xlu1 %706 }
  0xf9   : > { %1612 = vmatmul.mubr.msk.bf16.vlgmr.msra.gmra.mxu0 %vm508_vm0, %v707_v21 }
  0xfa   : > { %1623 = vmatprep.mubr.msk.bf16.mxu0 %vm2081_vm1, %v2080_v1 }
 0x143   : > { %v2366_v13 = vpop.f32.mrf.mxu0 }
 0x144   : > { %v558_v14 = vsel %vm2362_vm5, %v2366_v13, -1e+32 }
 0x145   : > { %v1595_v15 = vpop.f32.mrf.mxu0  ;;  %v559_v16 = vsel %vm508_vm0, %v558_v14, -inf }
 0x146   : > { %560 = vmax.xlane.f32.xlu0 %v559_v16 }
 0x147   : > { %v552_v17 = vpop.f32.mrf.mxu0 }
 0x149   : > { %v1596_v18 = vpop.f32.mrf.mxu0 }
 0x1b9   : > { %v2386_v29 = vpop.f32.mrf.mxu0 }
 0x1ba   : > { %v759_v30 = vsel %vm2362_vm5, %v2386_v29, -1e+32 }
 0x1bb   : > { %v760_v31 = vsel %vm508_vm0, %v759_v30, -inf  ;;  %v1613_v32 = vpop.f32.mrf.mxu0 }
 0x1bc   : > { %761 = vmax.xlane.f32.xlu1 %v760_v31 }
 0x1bd   : > { %v756_v33 = vpop.f32.mrf.mxu0 }
 0x1bf   : > { %v1614_v34 = vpop.f32.mrf.mxu0 }
 0x1cf   : > { %v561_v22 = vpop.xlane.xlu0 %560 }
 0x1d0   : > { %v562_v23 = vsub.f32 %v558_v14, %v561_v22  ;;  %v1773_v14 = vld [vmem:[%s2322_s26] ss:$0 sps:$4 sm:$0xff]  }
 0x1d2   : > { %v563_v24 = vmul.f32 1.442695, %v562_v23 }
 0x1d4   : > { %1779 = vpow2.f32 %v563_v24 }
 0x1e1   : > { %v1780_v25 = vpop.eup %1779 }
 0x1e2   : > { %v565_v26 = vsel %vm508_vm0, %v1780_v25, 0.0 }
 0x1e3   : > { %566 = vadd.xlane.f32.xlu0 %v565_v26 }
 0x245   : > { %v762_v63 = vpop.xlane.xlu1 %761 }
 0x246   : > { %v763_v0 = vsub.f32 %v759_v30, %v762_v63 }
 0x248   : > { %v764_v4 = vmul.f32 1.442695, %v763_v0 }
 0x26c   : > { %v567_v35 = vpop.xlane.xlu0 %566 }
 0x26d   : > { %1781 = vrcp.f32 %v567_v35 }
 0x27a   : > { %v1782_v37 = vpop.eup %1781 }
 0x27b   : > { %v570_v39 = vmul.f32 %v1782_v37, %v1780_v25 }
 0x27d   : > { %v574_v40 = vsel %vm2392_vm7, %v570_v39, 0.0 }
 0x27e   : > { %v575_v41 = vpack.c.bf16 %v574_v40, %v574_v40 }
 0x280   : > { %1600 = vmatmul.mubr.msk.bf16.vlgmr.msra.gmra.mxu1 %vm508_vm0, %v575_v41 }
 0x281   : > { %1605 = vmatprep.mubr.msk.bf16.mxu1 %vm2081_vm1, %v2080_v1  ;;  %1604 = vmatpush3.bf16.msra.mxu1 %v657_v11 }
 0x282   : > { %1615 = vmatprep.subr.bf16.mxu1 %v2080_v1 }
 0x340   : > { %v617_v43 = vpop.f32.mrf.mxu1 }
 0x341   : > { %v623_v44 = vmul.f32 %v617_v43, %v2404_v42 }
 0x342   : > { %v1601_v45 = vpop.f32.mrf.mxu1 }
 0x343   : > { %v624_v46 = vmax.f32 %v623_v44, 0.0 }
 0x344   : > { %v620_v47 = vpop.f32.mrf.mxu1 }
 0x345   : > { %1783 = vrsqrt.f32 %v624_v46  ;;  %vm627_vm8 = vcmp.eq.f32.partialorder %v624_v46, inf  ;;  %v630_v51 = vand.u32 2147483648, %v624_v46  ;;  %vm629_vm9 = vcmp.eq.f32.partialorder %v624_v46, 0.0 }
 0x346   : > { %v1602_v48 = vpop.f32.mrf.mxu1 }
 0x352   : > { %v1784_v49 = vpop.eup %1783 }
 0x353   : > { %v626_v50 = vmul.f32 %v1784_v49, %v624_v46 }
 0x355   : > { %v628_v53 = vsel %vm627_vm8, %v624_v46, %v626_v50  ;;  %v827_v50 = vstv %s1546_s15 }
 0x356   : > { %v631_v54 = vsel %vm629_vm9, %v630_v51, %v628_v53 }
 0x357   : > { %v634_v55 = vmul.f32 %v633_v52, %v631_v54 }
 0x359   : > { %v635_v56 = vmul.f32 1.442695, %v634_v55 }
 0x35b   : > { %1785 = vpow2.f32 %v635_v56 }
 0x368   : > { %v1786_v57 = vpop.eup %1785 }
 0x369   : > { %v637_v58 = vmax.f32 %v1786_v57, 1e-05 }
 0x36b   : > { %v638_v59 = vmin.f32 %v637_v58, 100000.0 }
 0x36d   : > { %v639_v60 = vmul.f32 %v638_v59, %v2366_v13  ;;  %v1772_v13 = vld [vmem:[%s2328_s20] ss:$0 sps:$4 sm:$0xff]  }
 0x36f   : > { %v640_v61 = vsel %vm2392_vm7, %v639_v60, -1e+32 }
 0x370   : > { %v641_v62 = vsel %vm508_vm0, %v640_v61, -inf }
 0x371   : > { %642 = vmax.xlane.f32.xlu0 %v641_v62 }
 0x3fa   : > { %v643_v2 = vpop.xlane.xlu0 %642 }
 0x3fb   : > { %v644_v3 = vsub.f32 %v640_v61, %v643_v2  ;;  %v1776_v61 = vld [vmem:[%s2322_s26] ss:$0 sps:$4 sm:$0xff]   ;;  %s2086_s26 = smov 8  }
 0x3fd   : > { %v645_v5 = vmul.f32 1.442695, %v644_v3 }
 0x3ff   : > { %1787 = vpow2.f32 %v645_v5 }
 0x400   : > { %1789 = vpow2.f32 %v764_v4 }
 0x40c   : > { %v1788_v6 = vpop.eup %1787 }
 0x40d   : > { %v647_v7 = vsel %vm508_vm0, %v1788_v6, 0.0  ;;  %v1790_v8 = vpop.eup %1789 }
 0x40e   : > { %648 = vadd.xlane.f32.xlu0 %v647_v7  ;;  %v766_v9 = vsel %vm508_vm0, %v1790_v8, 0.0 }
 0x412   : > { %767 = vadd.xlane.f32.xlu0 %v766_v9  ;;  %v1775_v9 = vld [vmem:[%s2328_s20] ss:$0 sps:$4 sm:$0xff]   ;;  %s1560_s20 = sld [smem:[#allocation2 + $0x3]] }
 0x428   : > { %915 = vrot.lane.b32.xlu0 %v1772_v13, %s2084_s10 }
 0x42c   : > { %910 = vrot.lane.b32.xlu0 %v1773_v14, %s2084_s10 }
 0x497   : > { %v649_v15 = vpop.xlane.xlu0 %648 }
 0x498   : > { %1791 = vrcp.f32 %v649_v15 }
 0x49b   : > { %v768_v16 = vpop.xlane.xlu0 %767 }
 0x49c   : > { %1793 = vrcp.f32 %v768_v16 }
 0x49f   : > { %v916_v22 = vpop.permute.xlu0 %915 }
 0x4a0   : > { %v921_v24 = vsel %vm508_vm0, %v916_v22, 0 }
 0x4a3   : > { %v911_v26 = vpop.permute.xlu0 %910 }
 0x4a5   : > { %v1792_v17 = vpop.eup %1791 }
 0x4a6   : > { %v651_v18 = vmul.f32 %v1792_v17, %v1788_v6 }
 0x4a8   : > { %v652_v19 = vpack.c.bf16 %v651_v18, %v651_v18 }
 0x4a9   : > { %v1794_v20 = vpop.eup %1793 }
 0x4aa   : > { %1606 = vmatmul.mubr.msk.bf16.vlgmr.msra.gmra.mxu1 %vm508_vm0, %v652_v19  ;;  %v771_v21 = vmul.f32 %v1794_v20, %v1790_v8  ;;  %v1774_v8 = vld [vmem:[%s2334_s21] ss:$0 sps:$4 sm:$0xff]  }
 0x4ab   : > { %1616 = vmatpush3.bf16.msra.mxu1 %v2382_v28  ;;  %1617 = vmatprep.mubr.msk.bf16.mxu1 %vm2081_vm1, %v2080_v1 }
 0x4ac   : > { %1627 = vmatprep.subr.bf16.mxu1 %v2080_v1  ;;  %v772_v23 = vsel %vm2392_vm7, %v771_v21, 0.0 }
 0x4ad   : > { %v773_v25 = vpack.c.bf16 %v772_v23, %v772_v23 }
 0x4b2   : > { %1618 = vmatmul.mubr.msk.bf16.vlgmr.msra.gmra.mxu1 %vm508_vm0, %v773_v25 }
 0x4b3   : > { %1628 = vmatpush3.bf16.xpose.msra.mxu1 %v921_v24  ;;  %1629 = vmatprep.mubr.msk.bf16.mxu1 %vm2081_vm1, %v2080_v1 }
 0x4b4   : > { %1639 = vmatprep.subr.bf16.mxu1 %v2080_v1 }
 0x4ba   : > { %1630 = vmatmul.mubr.msk.bf16.vlgmr.msra.gmra.mxu1 %vm508_vm0, %v911_v26 }
 0x4bb   : > { %1641 = vmatprep.mubr.msk.bf16.mxu1 %vm2081_vm1, %v2080_v1 }
 0x56a   : > { %v693_v27 = vpop.f32.mrf.mxu1 }
 0x56b   : > { %699 = vst.msk [vmem:[%s2436_s19] sm:$0xff] %vm508_vm0, %v693_v27 }
 0x56c   : > { %v1607_v30 = vpop.f32.mrf.mxu1 }
 0x56e   : > { %v696_v31 = vpop.f32.mrf.mxu1 }
 0x570   : > { %v1608_v32 = vpop.f32.mrf.mxu1 }
 0x572   : > { %v811_v33 = vpop.f32.mrf.mxu1 }
 0x573   : > { %v817_v34 = vmul.f32 %v811_v33, %v2404_v42 }
 0x574   : > { %v1619_v35 = vpop.f32.mrf.mxu1 }
 0x575   : > { %v818_v36 = vmax.f32 %v817_v34, 0.0 }
 0x576   : > { %v814_v37 = vpop.f32.mrf.mxu1 }
 0x577   : > { %1795 = vrsqrt.f32 %v818_v36  ;;  %vm821_vm10 = vcmp.eq.f32.partialorder %v818_v36, inf  ;;  %v824_v49 = vand.u32 2147483648, %v818_v36  ;;  %vm823_vm11 = vcmp.eq.f32.partialorder %v818_v36, 0.0 }
 0x578   : > { %v1620_v39 = vpop.f32.mrf.mxu1 }
 0x57a   : > { %v2441_v40 = vpop.f32.mrf.mxu1 }
 0x57b   : > { %v963_v41 = vsel %vm2362_vm5, %v2441_v40, -1e+32 }
 0x57c   : > { %v964_v43 = vsel %vm508_vm0, %v963_v41, -inf  ;;  %v1631_v44 = vpop.f32.mrf.mxu1 }
 0x57d   : > { %965 = vmax.xlane.f32.xlu0 %v964_v43 }
 0x57e   : > { %v960_v45 = vpop.f32.mrf.mxu1 }
 0x580   : > { %v1632_v46 = vpop.f32.mrf.mxu1 }
 0x584   : > { %v1796_v47 = vpop.eup %1795 }
 0x585   : > { %v820_v48 = vmul.f32 %v1796_v47, %v818_v36 }
 0x587   : > { %v822_v51 = vsel %vm821_vm10, %v818_v36, %v820_v48 }
 0x588   : > { %v825_v52 = vsel %vm823_vm11, %v824_v49, %v822_v51  ;;  %v1031_v49 = vstv %s1553_s22 }
 0x589   : > { %v828_v53 = vmul.f32 %v827_v50, %v825_v52 }
 0x58b   : > { %v829_v54 = vmul.f32 1.442695, %v828_v53 }
 0x58d   : > { %1797 = vpow2.f32 %v829_v54 }
 0x593   : > { %1114 = vrot.lane.b32.xlu0 %v1776_v61, %s2085_s2 }
 0x59a   : > { %v1798_v55 = vpop.eup %1797 }
 0x59b   : > { %v831_v56 = vmax.f32 %v1798_v55, 1e-05 }
 0x59d   : > { %v832_v57 = vmin.f32 %v831_v56, 100000.0 }
 0x59f   : > { %v833_v58 = vmul.f32 %v832_v57, %v2386_v29 }
 0x5a1   : > { %v834_v59 = vsel %vm2392_vm7, %v833_v58, -1e+32 }
 0x5a2   : > { %v835_v60 = vsel %vm508_vm0, %v834_v59, -inf }
 0x5a3   : > { %836 = vmax.xlane.f32.xlu1 %v835_v60 }
 0x606   : > { %v966_v62 = vpop.xlane.xlu0 %965 }
 0x607   : > { %v967_v63 = vsub.f32 %v963_v41, %v966_v62 }
 0x609   : > { %v968_v0 = vmul.f32 1.442695, %v967_v63 }
 0x60a   : > { %v1115_v24 = vpop.permute.xlu0 %1114 }
 0x60b   : > { %1799 = vpow2.f32 %v968_v0 }
 0x618   : > { %v1800_v2 = vpop.eup %1799 }
 0x619   : > { %v970_v3 = vsel %vm508_vm0, %v1800_v2, 0.0 }
 0x61a   : > { %971 = vadd.xlane.f32.xlu1 %v970_v3 }
 0x62c   : > { %v837_v29 = vpop.xlane.xlu1 %836 }
 0x62d   : > { %v838_v4 = vsub.f32 %v834_v59, %v837_v29 }
 0x62f   : > { %v839_v5 = vmul.f32 1.442695, %v838_v4  ;;  %v1777_v4 = vld [vmem:[%s2334_s21] ss:$0 sps:$4 sm:$0xff]  }
 0x631   : > { %1801 = vpow2.f32 %v839_v5 }
 0x63e   : > { %v1802_v6 = vpop.eup %1801 }
 0x63f   : > { %v841_v7 = vsel %vm508_vm0, %v1802_v6, 0.0 }
 0x640   : > { %842 = vadd.xlane.f32.xlu1 %v841_v7 }
 0x651   : > { %850 = vrot.lane.b32.xlu1 %v1774_v8, %s2083_s1 }
 0x655   : > { %1119 = vrot.lane.b32.xlu1 %v1775_v9, %s2085_s2 }
 0x6a3   : > { %v972_v10 = vpop.xlane.xlu1 %971 }
 0x6c9   : > { %v843_v11 = vpop.xlane.xlu1 %842 }
 0x6ca   : > { %1803 = vrcp.f32 %v843_v11 }
 0x6cb   : > { %1805 = vrcp.f32 %v972_v10 }
 0x6cd   : > { %v851_v13 = vpop.permute.xlu1 %850 }
 0x6ce   : > { %v856_v14 = vsel %vm579_vm6, %v851_v13, 0 }
 0x6cf   : > { %1622 = vmatpush3.bf16.msra.mxu0 %v856_v14 }
 0x6d0   : > { %1633 = vmatprep.subr.bf16.mxu0 %v2080_v1 }
 0x6d1   : > { %v1120_v20 = vpop.permute.xlu1 %1119 }
 0x6d2   : > { %v1125_v22 = vsel %vm508_vm0, %v1120_v20, 0 }
 0x6d7   : > { %v1804_v15 = vpop.eup %1803 }
 0x6d8   : > { %v1806_v16 = vpop.eup %1805  ;;  %v845_v17 = vmul.f32 %v1804_v15, %v1802_v6 }
 0x6d9   : > { %v975_v19 = vmul.f32 %v1806_v16, %v1800_v2 }
 0x6da   : > { %v846_v18 = vpack.c.bf16 %v845_v17, %v845_v17 }
 0x6db   : > { %v976_v21 = vsel %vm2392_vm7, %v975_v19, 0.0 }
 0x6dc   : > { %1624 = vmatmul.mubr.msk.bf16.vlgmr.msra.gmra.mxu0 %vm508_vm0, %v846_v18  ;;  %v977_v23 = vpack.c.bf16 %v976_v21, %v976_v21 }
 0x6dd   : > { %1634 = vmatpush3.bf16.msra.mxu0 %v2382_v28  ;;  %1635 = vmatprep.mubr.msk.bf16.mxu0 %vm2081_vm1, %v2080_v1 }
 0x6de   : > { %1645 = vmatprep.subr.bf16.mxu0 %v2080_v1 }
 0x6e4   : > { %1636 = vmatmul.mubr.msk.bf16.vlgmr.msra.gmra.mxu0 %vm508_vm0, %v977_v23 }
 0x6e5   : > { %1646 = vmatpush3.bf16.xpose.msra.mxu0 %v1125_v22  ;;  %1647 = vmatprep.mubr.msk.bf16.mxu0 %vm2081_vm1, %v2080_v1 }
 0x6e6   : > { %1657 = vmatprep.subr.bf16.mxu0 %v2080_v1 }
 0x6ec   : > { %1648 = vmatmul.mubr.msk.bf16.vlgmr.msra.gmra.mxu0 %vm508_vm0, %v1115_v24 }
 0x6ed   : > { %1659 = vmatprep.mubr.msk.bf16.mxu0 %vm2081_vm1, %v2080_v1 }
 0x79c   : > { %v892_v25 = vpop.f32.mrf.mxu0 }
 0x79e   : > { %v1625_v26 = vpop.f32.mrf.mxu0 }
 0x7a0   : > { %v895_v27 = vpop.f32.mrf.mxu0 }
 0x7a2   : > { %v1626_v30 = vpop.f32.mrf.mxu0 }
 0x7a4   : > { %v1015_v31 = vpop.f32.mrf.mxu0 }
 0x7a5   : > { %v1021_v32 = vmul.f32 %v1015_v31, %v2404_v42 }
 0x7a6   : > { %v1637_v33 = vpop.f32.mrf.mxu0 }
 0x7a7   : > { %v1022_v34 = vmax.f32 %v1021_v32, 0.0  ;;  %v1235_v32 = vstv %s1560_s20 }
 0x7a8   : > { %v1018_v35 = vpop.f32.mrf.mxu0 }
 0x7a9   : > { %1807 = vrsqrt.f32 %v1022_v34  ;;  %vm1025_vm12 = vcmp.eq.f32.partialorder %v1022_v34, inf  ;;  %v1028_v48 = vand.u32 2147483648, %v1022_v34  ;;  %vm1027_vm13 = vcmp.eq.f32.partialorder %v1022_v34, 0.0 }
 0x7aa   : > { %v1638_v36 = vpop.f32.mrf.mxu0 }
 0x7ac   : > { %v2477_v37 = vpop.f32.mrf.mxu0 }
 0x7ad   : > { %v1167_v39 = vsel %vm2362_vm5, %v2477_v37, -1e+32 }
 0x7ae   : > { %v1168_v41 = vsel %vm508_vm0, %v1167_v39, -inf  ;;  %v1649_v43 = vpop.f32.mrf.mxu0 }
 0x7af   : > { %1169 = vmax.xlane.f32.xlu0 %v1168_v41 }
 0x7b0   : > { %v1164_v44 = vpop.f32.mrf.mxu0 }
 0x7b2   : > { %v1650_v45 = vpop.f32.mrf.mxu0 }
 0x7b6   : > { %v1808_v46 = vpop.eup %1807 }
 0x7b7   : > { %v1024_v47 = vmul.f32 %v1808_v46, %v1022_v34 }
 0x7b9   : > { %v1026_v50 = vsel %vm1025_vm12, %v1022_v34, %v1024_v47 }
 0x7ba   : > { %v1029_v51 = vsel %vm1027_vm13, %v1028_v48, %v1026_v50 }
 0x7bb   : > { %v1032_v52 = vmul.f32 %v1031_v49, %v1029_v51 }
 0x7bd   : > { %v1033_v53 = vmul.f32 1.442695, %v1032_v52  ;;  %v1778_v52 = vld [vmem:[%s2334_s21] ss:$0 sps:$4 sm:$0xff]   ;;  %s2088_s21 = smov 24  }
 0x7bf   : > { %1809 = vpow2.f32 %v1033_v53 }
 0x7cc   : > { %v1810_v12 = vpop.eup %1809 }
 0x7cd   : > { %v1035_v54 = vmax.f32 %v1810_v12, 1e-05 }
 0x7cf   : > { %v1036_v55 = vmin.f32 %v1035_v54, 100000.0 }
 0x7d1   : > { %v1037_v56 = vmul.f32 %v1036_v55, %v2441_v40 }
 0x7d3   : > { %v1038_v57 = vsel %vm2392_vm7, %v1037_v56, -1e+32 }
 0x7d4   : > { %v1039_v58 = vsel %vm508_vm0, %v1038_v57, -inf }
 0x7d5   : > { %1040 = vmax.xlane.f32.xlu1 %v1039_v58 }
 0x838   : > { %v1170_v59 = vpop.xlane.xlu0 %1169 }
 0x839   : > { %v1171_v60 = vsub.f32 %v1167_v39, %v1170_v59 }
 0x83b   : > { %v1172_v61 = vmul.f32 1.442695, %v1171_v60 }
 0x83d   : > { %1811 = vpow2.f32 %v1172_v61 }
 0x84a   : > { %v1812_v62 = vpop.eup %1811 }
 0x84b   : > { %v1174_v63 = vsel %vm508_vm0, %v1812_v62, 0.0 }
 0x84c   : > { %1175 = vadd.xlane.f32.xlu1 %v1174_v63 }
 0x85e   : > { %v1041_v0 = vpop.xlane.xlu1 %1040 }
 0x85f   : > { %v1042_v2 = vsub.f32 %v1038_v57, %v1041_v0 }
 0x861   : > { %v1043_v3 = vmul.f32 1.442695, %v1042_v2 }
 0x863   : > { %1813 = vpow2.f32 %v1043_v3 }
 0x870   : > { %v1814_v40 = vpop.eup %1813 }
 0x871   : > { %v1045_v29 = vsel %vm508_vm0, %v1814_v40, 0.0 }
 0x872   : > { %1046 = vadd.xlane.f32.xlu1 %v1045_v29 }
 0x883   : > { %1054 = vrot.lane.b32.xlu1 %v1777_v4, %s2084_s10  ;;  %s1982_s10 = scalar_lea.vmem %s1981_s18, 256 }
 0x884   : > { %p1984_p6 = scmp.lt.s32.totalorder %s1982_s10, %s1976_s17 }
 0x886   : > { %p1985_p11 = por %p1984_p6, %p1983_p12 }
 0x887   : > { %899 = vrot.lane.b32.xlu1 %v892_v25, %s2086_s26 }
 0x888   : > { %p1986_p1 = pnand %p1985_p11, %p1979_p5 }
 0x8d5   : > { %v1176_v5 = vpop.xlane.xlu1 %1175 }
 0x8fb   : > { %v1047_v6 = vpop.xlane.xlu1 %1046 }
 0x8fc   : > { %1815 = vrcp.f32 %v1047_v6 }
 0x8fd   : > { %1817 = vrcp.f32 %v1176_v5 }
 0x8ff   : > { %v1055_v7 = vpop.permute.xlu1 %1054 }
 0x900   : > { %v1060_v8 = vsel %vm579_vm6, %v1055_v7, 0 }
 0x901   : > { %1640 = vmatpush3.bf16.msra.mxu1 %v1060_v8 }
 0x902   : > { %1651 = vmatprep.subr.bf16.mxu1 %v2080_v1 }
 0x903   : > { %v900_v9 = vpop.permute.xlu1 %899 }
 0x904   : > { %903 = vst.msk [vmem:[%s2436_s19] sm:$0xff] %vm902_vm14, %v900_v9 }
 0x909   : > { %v1816_v10 = vpop.eup %1815 }
 0x90a   : > { %v1818_v11 = vpop.eup %1817  ;;  %v1049_v13 = vmul.f32 %v1816_v10, %v1814_v40 }
 0x90b   : > { %v1179_v15 = vmul.f32 %v1818_v11, %v1812_v62 }
 0x90c   : > { %v1050_v14 = vpack.c.bf16 %v1049_v13, %v1049_v13 }
 0x90d   : > { %v1180_v16 = vsel %vm2392_vm7, %v1179_v15, 0.0 }
 0x90e   : > { %1642 = vmatmul.mubr.msk.bf16.vlgmr.msra.gmra.mxu1 %vm508_vm0, %v1050_v14  ;;  %v1181_v17 = vpack.c.bf16 %v1180_v16, %v1180_v16 }
 0x90f   : > { %1652 = vmatpush3.bf16.msra.mxu1 %v2382_v28  ;;  %1653 = vmatprep.mubr.msk.bf16.mxu1 %vm2081_vm1, %v2080_v1 }
 0x916   : > { %1654 = vmatmul.mubr.msk.bf16.vlgmr.msra.gmra.mxu1 %vm508_vm0, %v1181_v17 }
 0x9ce   : > { %v1096_v18 = vpop.f32.mrf.mxu1 }
 0x9cf   : > { %1103 = vrot.lane.b32.xlu1 %v1096_v18, %s2087_s25 }
 0x9d0   : > { %v1643_v19 = vpop.f32.mrf.mxu1 }
 0x9d2   : > { %v1099_v20 = vpop.f32.mrf.mxu1 }
 0x9d4   : > { %v1644_v21 = vpop.f32.mrf.mxu1 }
 0x9d6   : > { %v1219_v22 = vpop.f32.mrf.mxu1 }
 0x9d7   : > { %v1225_v23 = vmul.f32 %v1219_v22, %v2404_v42 }
 0x9d8   : > { %v1655_v24 = vpop.f32.mrf.mxu1 }
 0x9d9   : > { %v1226_v28 = vmax.f32 %v1225_v23, 0.0 }
 0x9da   : > { %v1222_v25 = vpop.f32.mrf.mxu1 }
 0x9db   : > { %1819 = vrsqrt.f32 %v1226_v28  ;;  %vm1229_vm15 = vcmp.eq.f32.partialorder %v1226_v28, inf  ;;  %v1232_v31 = vand.u32 2147483648, %v1226_v28  ;;  %vm1231_vm1 = vcmp.eq.f32.partialorder %v1226_v28, 0.0 }
 0x9dc   : > { %v1656_v26 = vpop.f32.mrf.mxu1 }
 0x9e8   : > { %v1820_v27 = vpop.eup %1819 }
 0x9e9   : > { %v1228_v30 = vmul.f32 %v1820_v27, %v1226_v28 }
 0x9eb   : > { %v1230_v33 = vsel %vm1229_vm15, %v1226_v28, %v1228_v30 }
 0x9ec   : > { %v1233_v34 = vsel %vm1231_vm1, %v1232_v31, %v1230_v33 }
 0x9ed   : > { %v1236_v35 = vmul.f32 %v1235_v32, %v1233_v34 }
 0x9ef   : > { %v1237_v36 = vmul.f32 1.442695, %v1236_v35 }
 0x9f1   : > { %1821 = vpow2.f32 %v1237_v36 }
 0x9fe   : > { %v1822_v39 = vpop.eup %1821 }
 0x9ff   : > { %v1239_v42 = vmax.f32 %v1822_v39, 1e-05 }
 0xa01   : > { %v1240_v41 = vmin.f32 %v1239_v42, 100000.0 }
 0xa03   : > { %v1241_v43 = vmul.f32 %v1240_v41, %v2477_v37 }
 0xa05   : > { %v1242_v44 = vsel %vm2392_vm7, %v1241_v43, -1e+32 }
 0xa06   : > { %v1243_v45 = vsel %vm508_vm0, %v1242_v44, -inf }
 0xa07   : > { %1244 = vmax.xlane.f32.xlu0 %v1243_v45 }
 0xa41   : > { %v1104_v46 = vpop.permute.xlu1 %1103 }
 0xa42   : > { %1107 = vst.msk [vmem:[%s2436_s19] sm:$0xff] %vm1106_vm2, %v1104_v46 }
 0xa90   : > { %v1245_v47 = vpop.xlane.xlu0 %1244 }
 0xa91   : > { %v1246_v48 = vsub.f32 %v1242_v44, %v1245_v47 }
 0xa93   : > { %v1247_v49 = vmul.f32 1.442695, %v1246_v48 }
 0xa95   : > { %1823 = vpow2.f32 %v1247_v49 }
 0xaa2   : > { %v1824_v50 = vpop.eup %1823 }
 0xaa3   : > { %v1249_v51 = vsel %vm508_vm0, %v1824_v50, 0.0 }
 0xaa4   : > { %1250 = vadd.xlane.f32.xlu0 %v1249_v51 }
 0xaba   : > { %1258 = vrot.lane.b32.xlu0 %v1778_v52, %s2085_s2 }
 0xb2d   : > { %v1251_v38 = vpop.xlane.xlu0 %1250 }
 0xb2e   : > { %1825 = vrcp.f32 %v1251_v38 }
 0xb31   : > { %v1259_v37 = vpop.permute.xlu0 %1258 }
 0xb32   : > { %v1264_v53 = vsel %vm579_vm6, %v1259_v37, 0 }
 0xb33   : > { %1658 = vmatpush3.bf16.msra.mxu0 %v1264_v53 }
 0xb3b   : > { %v1826_v12 = vpop.eup %1825 }
 0xb3c   : > { %v1253_v54 = vmul.f32 %v1826_v12, %v1824_v50 }
 0xb3e   : > { %v1254_v55 = vpack.c.bf16 %v1253_v54, %v1253_v54 }
 0xb40   : > { %1660 = vmatmul.mubr.msk.bf16.vlgmr.msra.gmra.mxu0 %vm508_vm0, %v1254_v55 }
 0xc00   : > { %v1300_v56 = vpop.f32.mrf.mxu0 }
 0xc01   : > { %1307 = vrot.lane.b32.xlu1 %v1300_v56, %s2088_s21 }
 0xc02   : > { %v1661_v57 = vpop.f32.mrf.mxu0 }
 0xc04   : > { %v1303_v58 = vpop.f32.mrf.mxu0 }
 0xc06   : > { %v1662_v59 = vpop.f32.mrf.mxu0 }
 0xc73   : > { %v1308_v60 = vpop.permute.xlu1 %1307 }
 0xc74   : > { %1311 = vst.msk [vmem:[%s2436_s19] sm:$0xff] %vm1310_vm3, %v1308_v60 }
 0xc75   : > { %1317 = vst.msk [vmem:[%s2436_s19] sm:$0x1] %vm1316_vm4, %v2080_v1 }
 0xc76   : > { %1989 = shalt.err (!%p1986_p1)
}
 0xc77   : > { %s1990_s27 = scalar_lea.hbm %s2517_s13, 128  ;;  %s1994_s15 = scalar_lea.hbm %s2570_s8, 256 }
 0xc78   : > { %p1991_p3 = scmp.ne.s32.totalorder %s2517_s13, %s1990_s27  ;;  %p1995_p13 = scmp.lt.s32.totalorder %s2517_s13, %s2570_s8 }
 0xc79   : > { %p1996_p2 = scmp.lt.s32.totalorder %s1994_s15, %s1990_s27 }
 0xc7a   : > { %p1992_p9 = pnand %p1991_p3, %p2600_p8 }
 0xc7b   : > { %p1997_p4 = por %p1996_p2, %p1995_p13 }
 0xc7c   : > { %p1993_p10 = pneg %p1992_p9 }
 0xc7e   : > { %p1998_p7 = pnand %p1997_p4, %p1993_p10 }
 0xc80   : > { %2001 = shalt.err (!%p1998_p7)
}
 0xc81   : > { %1679 = dma.vmem_to_hbm [thread:$0]  (%p2600_p8), %s1334_s23, 128, %s2517_s13, %s1319_s16  }
 0xc82 PF: > { %s2601_s26 = sld [smem:[#allocation20_spill]] }
 0xc83   : > { %s2602_s25 = sld [smem:[#allocation24_spill]] }
 0xc84   : > { %s2603_s20 = sld [smem:[#allocation21_spill]] }
 0xc88   : > { %s1345_s21 = sand.u32 1, %s2601_s26  }
 0xc89   : > { %p2604_p0 = scmp.ne.s32.totalorder %s2602_s25, 0  ;;  %s1346_s11 = scalar_lea.sflag [#allocation4], %s1345_s21 }
 0xc8a   : > { %p2605_p5 = scmp.ge.s32.totalorder %s2603_s20, 2 }
 0xc8c   : > { %p1702_p12 = pnand %p2605_p5, %p2604_p0 }
 0xc8e   : > { %p1703_p6 = pneg %p1702_p12 }
 0xc90   : > { %2047 = dma.done.wait (%p1703_p6), %s1346_s11, 128  }
 0xc91   : > { %2049 = vsyncadd (%p1703_p6), %s1346_s11, 4294967168  ;;  %s29_s10 = sadd.s32 1, %s2603_s20   ;;  %s2606_s14 = sld [smem:[#allocation23_spill]] }
 0xc92   : > { %p26_p11 = scmp.ge.s32.totalorder %s29_s10, 4   ;;  %s2607_s23 = sld [smem:[#allocation22_spill]] }
 0xc93   : > { %s2608_s27 = smov %s2056_s28  ;;  %s2609_s28 = smov %s2060_s29 }
 0xc94   : > { %s2611_s30 = smov %s2068_s9  ;;  %28 = sbr.rel (!%p26_p11) target bundleno = 13 (0xd), region = 149 }
 0xc97   : > { %s2610_s29 = smov %s2606_s14 }
 0xc98   : > { %s2612_s9 = smov %s2607_s23 }
 0xc99   :  { %1351 = vsyncpa [#allocation3], 1 }
 0xc9a   :  { %1353 = vsyncpa [#allocation3 + $0x1], 1 }
 0xc9b   :  { %1354 = vsyncpa [#allocation8], 1 }
 0xc9c   :  { %1356 = vsyncpa [#allocation8 + $0x1], 1 }
 0xc9d   :  { %1357 = vsyncpa [#allocation11], 1 }
 0xc9e   :  { %1358 = vsyncpa [#allocation4], 1 }
 0xc9f   :  { %1360 = vsyncpa [#allocation4 + $0x1], 1 }
 0xca0   :  { %1361 = vsyncpa [#allocation5], 1 }
 0xca1   :  { %1363 = vsyncpa [#allocation5 + $0x1], 1 }

</bundles_post_ra>
